<compile_context>
chip_gen: v7x
topology: tpu7x:2x2x1
jax: 0.10.0
libtpu: 0.0.40
codegen_flags: <defaults>
</compile_context>

<pallas_src>
import functools

import jax
import jax.numpy as jnp
from jax.experimental import pallas as pl
from jax.experimental.pallas import tpu as pltpu


# --------------------------------------------------------------------------- #
# Kernel
# --------------------------------------------------------------------------- #
def _attention_kernel(x_ref, wqkv_ref, bqkv_ref, wproj_ref, bproj_ref, o_ref,
                      *, n_heads: int, head_dim: int, t_valid: int,
                      is_causal: bool, use_bf16_exp: bool):
    """One grid step == block_b batch samples.

    x_ref:     (Bb, Tp, D)    VMEM, bf16 (Tp = padded token count)
    wqkv_ref:  (D, 3D)        VMEM, bf16 (transposed; scale folded into q cols)
    bqkv_ref:  (1, 3D)        VMEM, f32  (scale folded into q part)
    wproj_ref: (D, D)         VMEM, bf16 (transposed)
    bproj_ref: (1, D)         VMEM, f32
    o_ref:     (Bb, Tp, D)    VMEM, output dtype
    """
    Bb, Tp, D = x_ref.shape
    H, hd = n_heads, head_dim
    BT = Bb * Tp
    BH = Bb * H

    # ---- qkv projection: one full-width GEMM, M = Bb*Tp --------------------
    x2 = x_ref[...].reshape(BT, D)                                    # bf16
    qkv = jnp.dot(x2, wqkv_ref[...],
                  preferred_element_type=jnp.float32)                 # (BT, 3D)
    qkv = qkv + bqkv_ref[...]                                         # f32

    # PyTorch reshape (T, 3, H, hd): last-axis column order is (three, h, d).
    def split_heads(t2):  # (BT, D) f32 -> (Bb*H, Tp, hd) bf16
        # cast BEFORE the relayout transpose: half the bytes moved.
        t4 = t2.reshape(Bb, Tp, H, hd).astype(jnp.bfloat16)
        t4 = jnp.transpose(t4, (0, 2, 1, 3))                          # (Bb,H,Tp,hd)
        return t4.reshape(BH, Tp, hd)

    q = split_heads(qkv[:, 0 * D:1 * D])   # scale already folded into weights
    k = split_heads(qkv[:, 1 * D:2 * D])
    v = split_heads(qkv[:, 2 * D:3 * D])

    # ---- scores: single batched MXU matmul over all (sample, head) pairs ---
    s = jnp.einsum('bqd,bkd->bqk', q, k,
                   preferred_element_type=jnp.float32)                # (BH,Tp,Tp)

    if is_causal or t_valid < Tp:
        row = jax.lax.broadcasted_iota(jnp.int32, (Tp, Tp), 0)
        col = jax.lax.broadcasted_iota(jnp.int32, (Tp, Tp), 1)
        valid = col < t_valid                                         # pad keys
        if is_causal:
            valid = jnp.logical_and(valid, row >= col)
        # finite fill: no exp(-inf - -inf) NaN hazard
        s = jnp.where(valid[None], s, -1e30)

    # ---- numerically stable softmax, normalization deferred to ctx ---------
    m = jnp.max(s, axis=-1, keepdims=True)                            # f32
    su = s - m
    if use_bf16_exp:
        # bf16 EUP (v6e/v7x): ~2x exp throughput; row-sum stays f32.
        p = jnp.exp(su.astype(jnp.bfloat16))                          # bf16
        l = jnp.sum(p.astype(jnp.float32), axis=-1, keepdims=True)    # f32
        p_mx = p
    else:
        # v5e: no bf16 EUP -> f32 exp, cast only at the MXU input.
        p = jnp.exp(su)                                               # f32
        l = jnp.sum(p, axis=-1, keepdims=True)
        p_mx = p.astype(jnp.bfloat16)

    ctx = jnp.einsum('bqk,bkd->bqd', p_mx, v,
                     preferred_element_type=jnp.float32)              # (BH,Tp,hd)
    # deferred normalization: multiply the small (BH,Tp,hd) tensor, not the
    # (BH,Tp,Tp) probabilities; reciprocal goes to the EUP slot.
    ctx = ctx * pl.reciprocal(l, approx=True)

    # ---- merge heads (== torch 'BhQd -> BQhd' + flatten(2)) + output proj --
    ctx4 = jnp.transpose(ctx.astype(jnp.bfloat16).reshape(Bb, H, Tp, hd),
                         (0, 2, 1, 3))                                # (Bb,Tp,H,hd)
    ctx2 = ctx4.reshape(BT, D)
    out = jnp.dot(ctx2, wproj_ref[...],
                  preferred_element_type=jnp.float32)                 # (BT, D)
    out = out + bproj_ref[...]
    o_ref[...] = out.reshape(Bb, Tp, D).astype(o_ref.dtype)


# --------------------------------------------------------------------------- #
# Hardware-aware heuristics
# --------------------------------------------------------------------------- #
def _round_up(x, m):
    return ((x + m - 1) // m) * m


def _tpu_generation():
    """Best-effort TPU generation from device_kind (None if unknown)."""
    try:
        kind = jax.devices()[0].device_kind.lower()
    except Exception:
        return None
    for g in (7, 6, 5, 4, 3, 2):
        if f"v{g}" in kind:
            return g
    return None


def _vmem_limit_bytes(gen):
    """Explicit per-generation scoped-VMEM limit (with headroom)."""
    phys = None
    try:
        phys = int(pltpu.get_tpu_info().vmem_capacity_bytes)
    except Exception:
        phys = None
    if phys is None or phys <= 0:
        phys = (64 << 20) if gen == 7 else (128 << 20)   # v7x: 64 MiB physical
    # ~25% headroom for compiler-internal scratch; cap at 96 MiB.
    return min(phys * 3 // 4, 96 << 20)


def _choose_block_b(B, Tp, D, n_heads, *, vmem_limit_bytes, out_itemsize=4,
                    p_itemsize=4, single_buffer_weights=True,
                    target_rows=256, max_block=None):
    """How many batch samples to pack per grid step.

    Bigger blocks give the MXU larger M and amortize per-step pipeline
    overhead; the accounting now includes the resident weights and the
    attn/ctx/out temporaries so the choice actually fits scoped VMEM.
    """
    H = n_heads
    weight_bufs = 1 if single_buffer_weights else 2
    weights = weight_bufs * ((D * 3 * D + D * D) * 2 + (3 * D + D) * 4)

    def per_block_bytes(bb):
        io = 2 * bb * Tp * D * 2 + 2 * bb * Tp * D * out_itemsize   # dbl-buf x/out
        qkv = bb * Tp * 3 * D * (4 + 2)                             # f32 qkv + bf16 q/k/v
        scores = bb * H * Tp * Tp * (4 + p_itemsize)                # s (f32) + p
        ctx = bb * Tp * D * (4 + 2) + bb * Tp * D * 4               # ctx f32+bf16, out f32
        return weights + io + qkv + scores + ctx

    budget = int(vmem_limit_bytes * 0.9)
    if max_block is None:
        max_block = B
    divisors = [d for d in range(1, max(1, max_block) + 1) if B % d == 0]
    fitting = [d for d in divisors if per_block_bytes(d) <= budget]
    if not fitting:
        return 1
    for d in fitting:                                # smallest that hits target
        if d * Tp >= target_rows:
            return d
    return fitting[-1]                               # else biggest that fits


# --------------------------------------------------------------------------- #
# Wrapper
# --------------------------------------------------------------------------- #
def prepare_attention_params(w_qkv, b_qkv, w_proj, b_proj, *, n_heads):
    """One-time weight prep (call once per layer, outside the hot path).

    w_qkv: (3D, D), b_qkv: (3D,), w_proj: (D, D), b_proj: (D,)  (PyTorch
    nn.Linear conventions).  Transposes to (in, out), folds 1/sqrt(head_dim)
    into the q columns / q bias, and casts MXU operands to bf16.
    """
    three_d, D = w_qkv.shape
    assert three_d == 3 * D and D % n_heads == 0
    scale = 1.0 / ((D // n_heads) ** 0.5)

    w_qkv_t = jnp.asarray(w_qkv, jnp.float32).T                       # (D, 3D)
    w_qkv_t = jnp.concatenate([w_qkv_t[:, :D] * scale, w_qkv_t[:, D:]], axis=1)
    b_qkv_f = jnp.asarray(b_qkv, jnp.float32)
    b_qkv_f = jnp.concatenate([b_qkv_f[:D] * scale,
                               b_qkv_f[D:]]).reshape(1, 3 * D)
    w_proj_t = jnp.asarray(w_proj, jnp.float32).T                     # (D, D)
    b_proj_f = jnp.asarray(b_proj, jnp.float32).reshape(1, D)

    return (w_qkv_t.astype(jnp.bfloat16), b_qkv_f,
            w_proj_t.astype(jnp.bfloat16), b_proj_f)


def attention_pallas(x, params, *, n_heads, is_causal=False, block_b=None,
                     out_dtype=None):
    """x: (B, T, D); params from prepare_attention_params()."""
    w_qkv_bf, b_qkv_f, w_proj_bf, b_proj_f = params
    B, T, D = x.shape
    assert D % n_heads == 0
    head_dim = D // n_heads
    out_dtype = x.dtype if out_dtype is None else jnp.dtype(out_dtype)

    gen = _tpu_generation()
    vmem_limit = _vmem_limit_bytes(gen)
    use_bf16_exp = gen in (6, 7)          # v5e: no bf16 EUP -> keep f32 exp

    # Lane/sublane-friendly token padding; pad keys masked inside the kernel.
    Tp = _round_up(T, 128) if T >= 128 else _round_up(T, 8)
    x_p = x if Tp == T else jnp.pad(x, ((0, 0), (0, Tp - T), (0, 0)))
    x_bf = x_p.astype(jnp.bfloat16)

    # v7x has 2 TensorCores: keep >= 2 parallel grid steps.
    max_block = B if gen != 7 else max(1, B // 2)
    target_rows = 512 if gen in (6, 7) else 256      # 256x256 MXU on v6e/v7x

    if block_b is None:
        block_b = _choose_block_b(
            B, Tp, D, n_heads,
            vmem_limit_bytes=vmem_limit,
            out_itemsize=out_dtype.itemsize,
            p_itemsize=2 if use_bf16_exp else 4,
            single_buffer_weights=True,
            target_rows=target_rows,
            max_block=max_block)
    assert B % block_b == 0

    kernel = functools.partial(_attention_kernel, n_heads=n_heads,
                               head_dim=head_dim, t_valid=T,
                               is_causal=is_causal, use_bf16_exp=use_bf16_exp)

    def build(single_buffer_weights):
        # Constant-index weights/biases: single-buffer them (their block is
        # revisited every grid step) to halve their VMEM footprint.
        wkw = ({"pipeline_mode": pl.Buffered(1)}
               if single_buffer_weights else {})
        return pl.pallas_call(
            kernel,
            out_shape=jax.ShapeDtypeStruct((B, Tp, D), out_dtype),
            grid_spec=pltpu.PrefetchScalarGridSpec(
                num_scalar_prefetch=0,
                grid=(B // block_b,),
                in_specs=[
                    pl.BlockSpec((block_b, Tp, D), lambda i: (i, 0, 0)),  # x
                    pl.BlockSpec((D, 3 * D), lambda i: (0, 0), **wkw),    # W_qkv^T
                    pl.BlockSpec((1, 3 * D), lambda i: (0, 0), **wkw),    # b_qkv
                    pl.BlockSpec((D, D), lambda i: (0, 0), **wkw),        # W_proj^T
                    pl.BlockSpec((1, D), lambda i: (0, 0), **wkw),        # b_proj
                ],
                out_specs=pl.BlockSpec((block_b, Tp, D), lambda i: (i, 0, 0)),
            ),
            compiler_params=pltpu.CompilerParams(
                dimension_semantics=("parallel",),
                vmem_limit_bytes=vmem_limit),
        )

    args = (x_bf, w_qkv_bf, b_qkv_f, w_proj_bf, b_proj_f)
    try:
        out = build(True)(*args)
    except Exception:
        # pipeline_mode=pl.Buffered(1) not supported by this JAX build; the
        # default double-buffered weights are still correct, just larger.
        out = build(False)(*args)

    return out if Tp == T else out[:, :T, :]


# --------------------------------------------------------------------------- #
# Pure-JAX reference (mirrors the PyTorch forward)
# --------------------------------------------------------------------------- #
def attention_ref(x, w_qkv, b_qkv, w_proj, b_proj, *, n_heads, is_causal=False):
    B, T, D = x.shape
    hd = D // n_heads
    scale = 1.0 / (hd ** 0.5)
    qkv = jnp.einsum('btd,ed->bte', x, w_qkv) + b_qkv                # (B,T,3D)
    qkv = qkv.reshape(B, T, 3, n_heads, hd)
    qkv = jnp.transpose(qkv, (2, 0, 3, 1, 4))                        # 3 B h T d
    q, k, v = qkv[0], qkv[1], qkv[2]
    s = jnp.einsum('bhqd,bhkd->bhqk', q, k) * scale
    if is_causal:
        mask = jnp.tril(jnp.ones((T, T), bool))
        s = jnp.where(mask[None, None], s, -jnp.inf)
    attn = jax.nn.softmax(s, axis=-1)
    wa = jnp.einsum('bhqk,bhkd->bqhd', attn, v).reshape(B, T, D)
    return jnp.einsum('btd,ed->bte', wa, w_proj) + b_proj


if __name__ == "__main__":
    # Small shapes consistent with the module: batch=2, seq=8 tokens, dim=32,
    # n_heads=4 (head_dim=8).
    B, T, D, H = 2, 8, 32, 4

    key = jax.random.PRNGKey(0)
    kx, kw1, kb1, kw2, kb2 = jax.random.split(key, 5)

    x = jax.random.normal(kx, (B, T, D), dtype=jnp.float32)
    w_qkv = jax.random.normal(kw1, (3 * D, D), dtype=jnp.float32) * 0.05
    b_qkv = jax.random.normal(kb1, (3 * D,), dtype=jnp.float32) * 0.02
    w_proj = jax.random.normal(kw2, (D, D), dtype=jnp.float32) * 0.05
    b_proj = jax.random.normal(kb2, (D,), dtype=jnp.float32) * 0.02

    # Weight prep hoisted out of the per-call hot path.
    params = prepare_attention_params(w_qkv, b_qkv, w_proj, b_proj, n_heads=H)

    # non-causal path
    out = attention_pallas(x, params, n_heads=H, is_causal=False)
    out = jax.block_until_ready(out)
    ref = attention_ref(x, w_qkv, b_qkv, w_proj, b_proj,
                        n_heads=H, is_causal=False)
    assert out.shape == (B, T, D)
    # bf16 MXU operands (and bf16 exp on v6e/v7x) -> loosened tolerance
    assert jnp.allclose(out, ref, atol=2e-2, rtol=2e-2)

    # causal path
    out_c = attention_pallas(x, params, n_heads=H, is_causal=True)
    out_c = jax.block_until_ready(out_c)
    ref_c = attention_ref(x, w_qkv, b_qkv, w_proj, b_proj,
                          n_heads=H, is_causal=True)
    assert jnp.allclose(out_c, ref_c, atol=2e-2, rtol=2e-2)

    print("KERNEL_OK")
</pallas_src>

<mosaic_0001>
module attributes {stable_mosaic.version = 11 : i64} {
  func.func @_attention_kernel(%arg0: i32, %arg1: memref<2x8x32xbf16, #tpu.memory_space<vmem>>, %arg2: memref<32x96xbf16, #tpu.memory_space<vmem>>, %arg3: memref<1x96xf32, #tpu.memory_space<vmem>>, %arg4: memref<32x32xbf16, #tpu.memory_space<vmem>>, %arg5: memref<1x32xf32, #tpu.memory_space<vmem>>, %arg6: memref<2x8x32xf32, #tpu.memory_space<vmem>>) attributes {dimension_semantics = [#tpu.dimension_semantics<parallel>], iteration_bounds = array<i64: 1>, scalar_prefetch = 0 : i64, scratch_operands = 0 : i64, tpu.core_type = #tpu.core_type<tc>, window_params = [{transform_indices = @transform_0, window_bounds = array<i64: 2, 8, 32>}, {pipeline_mode = #tpu.pipeline_mode<synchronous>, transform_indices = @transform_1, window_bounds = array<i64: 32, 96>}, {pipeline_mode = #tpu.pipeline_mode<synchronous>, transform_indices = @transform_2, window_bounds = array<i64: 1, 96>}, {pipeline_mode = #tpu.pipeline_mode<synchronous>, transform_indices = @transform_3, window_bounds = array<i64: 32, 32>}, {pipeline_mode = #tpu.pipeline_mode<synchronous>, transform_indices = @transform_4, window_bounds = array<i64: 1, 32>}, {transform_indices = @transform_5, window_bounds = array<i64: 2, 8, 32>}]} {
    %c0 = arith.constant 0 : index
    %c0_0 = arith.constant 0 : index
    %c0_1 = arith.constant 0 : index
    %0 = vector.load %arg1[%c0, %c0_0, %c0_1] : memref<2x8x32xbf16, #tpu.memory_space<vmem>>, vector<2x8x32xbf16>
    %1 = vector.shape_cast %0 : vector<2x8x32xbf16> to vector<16x32xbf16>
    %c0_2 = arith.constant 0 : index
    %c0_3 = arith.constant 0 : index
    %2 = vector.load %arg2[%c0_2, %c0_3] : memref<32x96xbf16, #tpu.memory_space<vmem>>, vector<32x96xbf16>
    %cst = arith.constant dense<0.000000e+00> : vector<16x96xf32>
    %3 = tpu.matmul %1, %2, %cst {dimension_numbers = #tpu.dot_dimension_numbers<[1], [0], [0], [1], [0, 0, 1, 1], [], []>} : vector<16x32xbf16>, vector<32x96xbf16>, vector<16x96xf32> -> vector<16x96xf32>
    %c0_4 = arith.constant 0 : index
    %c0_5 = arith.constant 0 : index
    %4 = vector.load %arg3[%c0_4, %c0_5] : memref<1x96xf32, #tpu.memory_space<vmem>>, vector<1x96xf32>
    %5 = vector.broadcast %4 : vector<1x96xf32> to vector<16x96xf32>
    %6 = arith.addf %3, %5 : vector<16x96xf32>
    %7 = vector.extract_strided_slice %6 {offsets = [0, 0], sizes = [16, 32], strides = [1, 1]} : vector<16x96xf32> to vector<16x32xf32>
    %8 = vector.shape_cast %7 : vector<16x32xf32> to vector<2x8x4x8xf32>
    %9 = arith.truncf %8 : vector<2x8x4x8xf32> to vector<2x8x4x8xbf16>
    %10 = tpu.transpose %9, [0, 2, 1, 3] : vector<2x8x4x8xbf16> -> vector<2x4x8x8xbf16>
    %11 = vector.shape_cast %10 : vector<2x4x8x8xbf16> to vector<8x8x8xbf16>
    %12 = vector.extract_strided_slice %6 {offsets = [0, 32], sizes = [16, 32], strides = [1, 1]} : vector<16x96xf32> to vector<16x32xf32>
    %13 = vector.shape_cast %12 : vector<16x32xf32> to vector<2x8x4x8xf32>
    %14 = arith.truncf %13 : vector<2x8x4x8xf32> to vector<2x8x4x8xbf16>
    %15 = tpu.transpose %14, [0, 2, 1, 3] : vector<2x8x4x8xbf16> -> vector<2x4x8x8xbf16>
    %16 = vector.shape_cast %15 : vector<2x4x8x8xbf16> to vector<8x8x8xbf16>
    %17 = vector.extract_strided_slice %6 {offsets = [0, 64], sizes = [16, 32], strides = [1, 1]} : vector<16x96xf32> to vector<16x32xf32>
    %18 = vector.shape_cast %17 : vector<16x32xf32> to vector<2x8x4x8xf32>
    %19 = arith.truncf %18 : vector<2x8x4x8xf32> to vector<2x8x4x8xbf16>
    %20 = tpu.transpose %19, [0, 2, 1, 3] : vector<2x8x4x8xbf16> -> vector<2x4x8x8xbf16>
    %21 = vector.shape_cast %20 : vector<2x4x8x8xbf16> to vector<8x8x8xbf16>
    "tpu.trace_start"() <{level = 10 : i32, message = "bqd,bkd->bqk"}> : () -> ()
    %cst_6 = arith.constant dense<0.000000e+00> : vector<8x8x8xf32>
    %22 = tpu.matmul %11, %16, %cst_6 {dimension_numbers = #tpu.dot_dimension_numbers<[2], [2], [1], [1], [0, 0, 0, 1, 1, 1], [0], [0]>} : vector<8x8x8xbf16>, vector<8x8x8xbf16>, vector<8x8x8xf32> -> vector<8x8x8xf32>
    "tpu.trace_stop"() : () -> ()
    %cst_7 = arith.constant dense<0xFF800000> : vector<8x8xf32>
    %23 = vector.multi_reduction <maximumf>, %22, %cst_7 [2] : vector<8x8x8xf32> to vector<8x8xf32>
    %24 = vector.shape_cast %23 : vector<8x8xf32> to vector<8x8x1xf32>
    %25 = vector.broadcast %24 : vector<8x8x1xf32> to vector<8x8x8xf32>
    %26 = arith.subf %22, %25 : vector<8x8x8xf32>
    %27 = math.exp %26 : vector<8x8x8xf32>
    %cst_8 = arith.constant dense<0.000000e+00> : vector<8x8xf32>
    %28 = vector.multi_reduction <add>, %27, %cst_8 [2] : vector<8x8x8xf32> to vector<8x8xf32>
    %29 = vector.shape_cast %28 : vector<8x8xf32> to vector<8x8x1xf32>
    %30 = arith.truncf %27 : vector<8x8x8xf32> to vector<8x8x8xbf16>
    "tpu.trace_start"() <{level = 10 : i32, message = "bqk,bkd->bqd"}> : () -> ()
    %cst_9 = arith.constant dense<0.000000e+00> : vector<8x8x8xf32>
    %31 = tpu.matmul %30, %21, %cst_9 {dimension_numbers = #tpu.dot_dimension_numbers<[2], [1], [1], [2], [0, 0, 0, 1, 1, 2], [0], [0]>} : vector<8x8x8xbf16>, vector<8x8x8xbf16>, vector<8x8x8xf32> -> vector<8x8x8xf32>
    "tpu.trace_stop"() : () -> ()
    %32 = tpu.reciprocal %29 {approx = true} : vector<8x8x1xf32> -> vector<8x8x1xf32>
    %33 = vector.broadcast %32 : vector<8x8x1xf32> to vector<8x8x8xf32>
    %34 = arith.mulf %31, %33 : vector<8x8x8xf32>
    %35 = arith.truncf %34 : vector<8x8x8xf32> to vector<8x8x8xbf16>
    %36 = vector.shape_cast %35 : vector<8x8x8xbf16> to vector<2x4x8x8xbf16>
    %37 = tpu.transpose %36, [0, 2, 1, 3] : vector<2x4x8x8xbf16> -> vector<2x8x4x8xbf16>
    %38 = vector.shape_cast %37 : vector<2x8x4x8xbf16> to vector<16x32xbf16>
    %c0_10 = arith.constant 0 : index
    %c0_11 = arith.constant 0 : index
    %39 = vector.load %arg4[%c0_10, %c0_11] : memref<32x32xbf16, #tpu.memory_space<vmem>>, vector<32x32xbf16>
    %cst_12 = arith.constant dense<0.000000e+00> : vector<16x32xf32>
    %40 = tpu.matmul %38, %39, %cst_12 {dimension_numbers = #tpu.dot_dimension_numbers<[1], [0], [0], [1], [0, 0, 1, 1], [], []>} : vector<16x32xbf16>, vector<32x32xbf16>, vector<16x32xf32> -> vector<16x32xf32>
    %c0_13 = arith.constant 0 : index
    %c0_14 = arith.constant 0 : index
    %41 = vector.load %arg5[%c0_13, %c0_14] : memref<1x32xf32, #tpu.memory_space<vmem>>, vector<1x32xf32>
    %42 = vector.broadcast %41 : vector<1x32xf32> to vector<16x32xf32>
    %43 = arith.addf %40, %42 : vector<16x32xf32>
    %44 = vector.shape_cast %43 : vector<16x32xf32> to vector<2x8x32xf32>
    %c0_15 = arith.constant 0 : index
    %c0_16 = arith.constant 0 : index
    %c0_17 = arith.constant 0 : index
    %45 = vector.load %arg6[%c0_15, %c0_16, %c0_17] : memref<2x8x32xf32, #tpu.memory_space<vmem>>, vector<2x8x32xf32>
    tpu.vector_store %arg6[%c0_15, %c0_16, %c0_17], %44 {strides = array<i32>} : memref<2x8x32xf32, #tpu.memory_space<vmem>>, vector<2x8x32xf32>,
    return
  }
  func.func @transform_0(%arg0: i32) -> (i32, i32, i32) {
    %c0_i32 = arith.constant 0 : i32
    %c0_i32_0 = arith.constant 0 : i32
    %c0_i32_1 = arith.constant 0 : i32
    return %arg0, %c0_i32, %c0_i32_0 : i32, i32, i32
  }
  func.func @transform_1(%arg0: i32) -> (i32, i32) {
    %c0_i32 = arith.constant 0 : i32
    %c0_i32_0 = arith.constant 0 : i32
    %c0_i32_1 = arith.constant 0 : i32
    return %c0_i32, %c0_i32_0 : i32, i32
  }
  func.func @transform_2(%arg0: i32) -> (i32, i32) {
    %c0_i32 = arith.constant 0 : i32
    %c0_i32_0 = arith.constant 0 : i32
    %c0_i32_1 = arith.constant 0 : i32
    return %c0_i32, %c0_i32_0 : i32, i32
  }
  func.func @transform_3(%arg0: i32) -> (i32, i32) {
    %c0_i32 = arith.constant 0 : i32
    %c0_i32_0 = arith.constant 0 : i32
    %c0_i32_1 = arith.constant 0 : i32
    return %c0_i32, %c0_i32_0 : i32, i32
  }
  func.func @transform_4(%arg0: i32) -> (i32, i32) {
    %c0_i32 = arith.constant 0 : i32
    %c0_i32_0 = arith.constant 0 : i32
    %c0_i32_1 = arith.constant 0 : i32
    return %c0_i32, %c0_i32_0 : i32, i32
  }
  func.func @transform_5(%arg0: i32) -> (i32, i32, i32) {
    %c0_i32 = arith.constant 0 : i32
    %c0_i32_0 = arith.constant 0 : i32
    %c0_i32_1 = arith.constant 0 : i32
    return %arg0, %c0_i32, %c0_i32_0 : i32, i32, i32
  }
}

module attributes {stable_mosaic.version = 11 : i64} {
  func.func @_attention_kernel(%arg0: i32, %arg1: memref<2x8x32xbf16, #tpu.memory_space<vmem>>, %arg2: memref<32x96xbf16, #tpu.memory_space<vmem>>, %arg3: memref<1x96xf32, #tpu.memory_space<vmem>>, %arg4: memref<32x32xbf16, #tpu.memory_space<vmem>>, %arg5: memref<1x32xf32, #tpu.memory_space<vmem>>, %arg6: memref<2x8x32xf32, #tpu.memory_space<vmem>>) attributes {dimension_semantics = [#tpu.dimension_semantics<parallel>], iteration_bounds = array<i64: 1>, scalar_prefetch = 0 : i64, scratch_operands = 0 : i64, tpu.core_type = #tpu.core_type<tc>, window_params = [{transform_indices = @transform_0, window_bounds = array<i64: 2, 8, 32>}, {pipeline_mode = #tpu.pipeline_mode<synchronous>, transform_indices = @transform_1, window_bounds = array<i64: 32, 96>}, {pipeline_mode = #tpu.pipeline_mode<synchronous>, transform_indices = @transform_2, window_bounds = array<i64: 1, 96>}, {pipeline_mode = #tpu.pipeline_mode<synchronous>, transform_indices = @transform_3, window_bounds = array<i64: 32, 32>}, {pipeline_mode = #tpu.pipeline_mode<synchronous>, transform_indices = @transform_4, window_bounds = array<i64: 1, 32>}, {transform_indices = @transform_5, window_bounds = array<i64: 2, 8, 32>}]} {
    %c0 = arith.constant 0 : index
    %c0_0 = arith.constant 0 : index
    %c0_1 = arith.constant 0 : index
    %0 = vector.load %arg1[%c0, %c0_0, %c0_1] : memref<2x8x32xbf16, #tpu.memory_space<vmem>>, vector<2x8x32xbf16>
    %1 = vector.shape_cast %0 : vector<2x8x32xbf16> to vector<16x32xbf16>
    %c0_2 = arith.constant 0 : index
    %c0_3 = arith.constant 0 : index
    %2 = vector.load %arg2[%c0_2, %c0_3] : memref<32x96xbf16, #tpu.memory_space<vmem>>, vector<32x96xbf16>
    %cst = arith.constant dense<0.000000e+00> : vector<16x96xf32>
    %3 = tpu.matmul %1, %2, %cst {dimension_numbers = #tpu.dot_dimension_numbers<[1], [0], [0], [1], [0, 0, 1, 1], [], []>} : vector<16x32xbf16>, vector<32x96xbf16>, vector<16x96xf32> -> vector<16x96xf32>
    %c0_4 = arith.constant 0 : index
    %c0_5 = arith.constant 0 : index
    %4 = vector.load %arg3[%c0_4, %c0_5] : memref<1x96xf32, #tpu.memory_space<vmem>>, vector<1x96xf32>
    %5 = vector.broadcast %4 : vector<1x96xf32> to vector<16x96xf32>
    %6 = arith.addf %3, %5 : vector<16x96xf32>
    %7 = vector.extract_strided_slice %6 {offsets = [0, 0], sizes = [16, 32], strides = [1, 1]} : vector<16x96xf32> to vector<16x32xf32>
    %8 = vector.shape_cast %7 : vector<16x32xf32> to vector<2x8x4x8xf32>
    %9 = arith.truncf %8 : vector<2x8x4x8xf32> to vector<2x8x4x8xbf16>
    %10 = tpu.transpose %9, [0, 2, 1, 3] : vector<2x8x4x8xbf16> -> vector<2x4x8x8xbf16>
    %11 = vector.shape_cast %10 : vector<2x4x8x8xbf16> to vector<8x8x8xbf16>
    %12 = vector.extract_strided_slice %6 {offsets = [0, 32], sizes = [16, 32], strides = [1, 1]} : vector<16x96xf32> to vector<16x32xf32>
    %13 = vector.shape_cast %12 : vector<16x32xf32> to vector<2x8x4x8xf32>
    %14 = arith.truncf %13 : vector<2x8x4x8xf32> to vector<2x8x4x8xbf16>
    %15 = tpu.transpose %14, [0, 2, 1, 3] : vector<2x8x4x8xbf16> -> vector<2x4x8x8xbf16>
    %16 = vector.shape_cast %15 : vector<2x4x8x8xbf16> to vector<8x8x8xbf16>
    %17 = vector.extract_strided_slice %6 {offsets = [0, 64], sizes = [16, 32], strides = [1, 1]} : vector<16x96xf32> to vector<16x32xf32>
    %18 = vector.shape_cast %17 : vector<16x32xf32> to vector<2x8x4x8xf32>
    %19 = arith.truncf %18 : vector<2x8x4x8xf32> to vector<2x8x4x8xbf16>
    %20 = tpu.transpose %19, [0, 2, 1, 3] : vector<2x8x4x8xbf16> -> vector<2x4x8x8xbf16>
    %21 = vector.shape_cast %20 : vector<2x4x8x8xbf16> to vector<8x8x8xbf16>
    "tpu.trace_start"() <{level = 10 : i32, message = "bqd,bkd->bqk"}> : () -> ()
    %cst_6 = arith.constant dense<0.000000e+00> : vector<8x8x8xf32>
    %22 = tpu.matmul %11, %16, %cst_6 {dimension_numbers = #tpu.dot_dimension_numbers<[2], [2], [1], [1], [0, 0, 0, 1, 1, 1], [0], [0]>} : vector<8x8x8xbf16>, vector<8x8x8xbf16>, vector<8x8x8xf32> -> vector<8x8x8xf32>
    "tpu.trace_stop"() : () -> ()
    %cst_7 = arith.constant dense<0xFF800000> : vector<8x8xf32>
    %23 = vector.multi_reduction <maximumf>, %22, %cst_7 [2] : vector<8x8x8xf32> to vector<8x8xf32>
    %24 = vector.shape_cast %23 : vector<8x8xf32> to vector<8x8x1xf32>
    %25 = vector.broadcast %24 : vector<8x8x1xf32> to vector<8x8x8xf32>
    %26 = arith.subf %22, %25 : vector<8x8x8xf32>
    %27 = math.exp %26 : vector<8x8x8xf32>
    %cst_8 = arith.constant dense<0.000000e+00> : vector<8x8xf32>
    %28 = vector.multi_reduction <add>, %27, %cst_8 [2] : vector<8x8x8xf32> to vector<8x8xf32>
    %29 = vector.shape_cast %28 : vector<8x8xf32> to vector<8x8x1xf32>
    %30 = arith.truncf %27 : vector<8x8x8xf32> to vector<8x8x8xbf16>
    "tpu.trace_start"() <{level = 10 : i32, message = "bqk,bkd->bqd"}> : () -> ()
    %cst_9 = arith.constant dense<0.000000e+00> : vector<8x8x8xf32>
    %31 = tpu.matmul %30, %21, %cst_9 {dimension_numbers = #tpu.dot_dimension_numbers<[2], [1], [1], [2], [0, 0, 0, 1, 1, 2], [0], [0]>} : vector<8x8x8xbf16>, vector<8x8x8xbf16>, vector<8x8x8xf32> -> vector<8x8x8xf32>
    "tpu.trace_stop"() : () -> ()
    %32 = tpu.reciprocal %29 {approx = true} : vector<8x8x1xf32> -> vector<8x8x1xf32>
    %33 = vector.broadcast %32 : vector<8x8x1xf32> to vector<8x8x8xf32>
    %34 = arith.mulf %31, %33 : vector<8x8x8xf32>
    %35 = arith.truncf %34 : vector<8x8x8xf32> to vector<8x8x8xbf16>
    %36 = vector.shape_cast %35 : vector<8x8x8xbf16> to vector<2x4x8x8xbf16>
    %37 = tpu.transpose %36, [0, 2, 1, 3] : vector<2x4x8x8xbf16> -> vector<2x8x4x8xbf16>
    %38 = vector.shape_cast %37 : vector<2x8x4x8xbf16> to vector<16x32xbf16>
    %c0_10 = arith.constant 0 : index
    %c0_11 = arith.constant 0 : index
    %39 = vector.load %arg4[%c0_10, %c0_11] : memref<32x32xbf16, #tpu.memory_space<vmem>>, vector<32x32xbf16>
    %cst_12 = arith.constant dense<0.000000e+00> : vector<16x32xf32>
    %40 = tpu.matmul %38, %39, %cst_12 {dimension_numbers = #tpu.dot_dimension_numbers<[1], [0], [0], [1], [0, 0, 1, 1], [], []>} : vector<16x32xbf16>, vector<32x32xbf16>, vector<16x32xf32> -> vector<16x32xf32>
    %c0_13 = arith.constant 0 : index
    %c0_14 = arith.constant 0 : index
    %41 = vector.load %arg5[%c0_13, %c0_14] : memref<1x32xf32, #tpu.memory_space<vmem>>, vector<1x32xf32>
    %42 = vector.broadcast %41 : vector<1x32xf32> to vector<16x32xf32>
    %43 = arith.addf %40, %42 : vector<16x32xf32>
    %44 = vector.shape_cast %43 : vector<16x32xf32> to vector<2x8x32xf32>
    %c0_15 = arith.constant 0 : index
    %c0_16 = arith.constant 0 : index
    %c0_17 = arith.constant 0 : index
    %45 = vector.load %arg6[%c0_15, %c0_16, %c0_17] : memref<2x8x32xf32, #tpu.memory_space<vmem>>, vector<2x8x32xf32>
    tpu.vector_store %arg6[%c0_15, %c0_16, %c0_17], %44 {strides = array<i32>} : memref<2x8x32xf32, #tpu.memory_space<vmem>>, vector<2x8x32xf32>,
    return
  }
  func.func @transform_0(%arg0: i32) -> (i32, i32, i32) {
    %c0_i32 = arith.constant 0 : i32
    %c0_i32_0 = arith.constant 0 : i32
    %c0_i32_1 = arith.constant 0 : i32
    return %arg0, %c0_i32, %c0_i32_0 : i32, i32, i32
  }
  func.func @transform_1(%arg0: i32) -> (i32, i32) {
    %c0_i32 = arith.constant 0 : i32
    %c0_i32_0 = arith.constant 0 : i32
    %c0_i32_1 = arith.constant 0 : i32
    return %c0_i32, %c0_i32_0 : i32, i32
  }
  func.func @transform_2(%arg0: i32) -> (i32, i32) {
    %c0_i32 = arith.constant 0 : i32
    %c0_i32_0 = arith.constant 0 : i32
    %c0_i32_1 = arith.constant 0 : i32
    return %c0_i32, %c0_i32_0 : i32, i32
  }
  func.func @transform_3(%arg0: i32) -> (i32, i32) {
    %c0_i32 = arith.constant 0 : i32
    %c0_i32_0 = arith.constant 0 : i32
    %c0_i32_1 = arith.constant 0 : i32
    return %c0_i32, %c0_i32_0 : i32, i32
  }
  func.func @transform_4(%arg0: i32) -> (i32, i32) {
    %c0_i32 = arith.constant 0 : i32
    %c0_i32_0 = arith.constant 0 : i32
    %c0_i32_1 = arith.constant 0 : i32
    return %c0_i32, %c0_i32_0 : i32, i32
  }
  func.func @transform_5(%arg0: i32) -> (i32, i32, i32) {
    %c0_i32 = arith.constant 0 : i32
    %c0_i32_0 = arith.constant 0 : i32
    %c0_i32_1 = arith.constant 0 : i32
    return %arg0, %c0_i32, %c0_i32_0 : i32, i32, i32
  }
}

</mosaic_0001>

<bundles_post_ra>
// kernel: tpu_custom_call.1
= control target key start
LH: loop header
LB: loop body
LE: loop exit
PB: predicated region body
PF: predicated region fallthrough
CT: control target
= control target key end

     0   :  { %10 = vsyncpa [#allocation3], 0  ;;  %s3264_s0 = inlined_call_operand.hbm [shape: bf16[2,8,32], index: 0, kind: input, shape index: {}]   ;;  %s3265_s1 = inlined_call_operand.hbm [shape: bf16[32,96], index: 1, kind: input, shape index: {}]   ;;  %s3266_s2 = inlined_call_operand.hbm [shape: f32[1,96], index: 2, kind: input, shape index: {}]   ;;  %s3267_s3 = inlined_call_operand.hbm [shape: bf16[32,32], index: 3, kind: input, shape index: {}]   ;;  %s3268_s4 = inlined_call_operand.hbm [shape: f32[1,32], index: 4, kind: input, shape index: {}]   ;;  %s3269_s5 = inlined_call_operand.hbm [shape: f32[2,8,32], index: 5, kind: output, shape index: {}]  }
   0x1   :  { %11 = vsyncpa [#allocation6], 0 }
   0x2   :  { %12 = vsyncpa [#allocation9], 0 }
   0x3   :  { %13 = vsyncpa [#allocation4], 0  ;;  %s2702_s18 = smov [#allocation5]   ;;  %s2703_s20 = smov [#allocation8]  }
   0x4   :  { %s31_s19 = sshll.u32 %s2702_s18, 4  ;;  %s53_s21 = sshll.u32 %s2703_s20, 4  ;;  %s32_s19 = int_to_ptr.vmem [resolvable:$true] %s31_s19  ;;  %s2753_s21 = int_to_ptr.vmem [resolvable:$true] %s53_s21 }
   0x5   :  { %s2562_s24 = scalar_lea.hbm %s3265_s1, 256 }
   0x6   :  { %p2563_p0 = scmp.ne.s32.totalorder %s3265_s1, %s2562_s24  ;;  %p2566_p1 = scmp.lt.u32.totalorder %s2562_s24, %s3265_s1 }
   0x8   :  { %p2568_p2 = pnand %p2566_p1, %p2563_p0 }
   0xa   :  { %2571 = shalt.err (!%p2568_p2)
}
   0xb   :  { %s2572_s29 = scalar_lea.vmem %s32_s19, 256  ;;  %p2577_p4 = scmp.lt.s32.totalorder %s32_s19, %s32_s19 }
   0xc   :  { %p2573_p3 = scmp.ne.s32.totalorder %s32_s19, %s2572_s29  ;;  %p2578_p5 = scmp.lt.s32.totalorder %s2572_s29, %s2572_s29 }
   0xe   :  { %p2579_p6 = por %p2578_p5, %p2577_p4 }
  0x10   :  { %p2580_p7 = pnand %p2579_p6, %p2573_p3 }
  0x12   :  { %2583 = shalt.err (!%p2580_p7)
}
  0x13   :  { %s2704_s30 = smov 64   ;;  %s2705_s6 = smov 4  }
  0x14   :  { %37 = dma.hbm_to_vmem [thread:$0]  %s3265_s1, 256, %s32_s19, [#allocation6], %s2704_s30, %s2704_s30, %s2705_s6  }
  0x15   :  { %s2584_s11 = scalar_lea.hbm %s3267_s3, 256 }
  0x16   :  { %p2585_p8 = scmp.ne.s32.totalorder %s3267_s3, %s2584_s11  ;;  %p2588_p9 = scmp.lt.u32.totalorder %s2584_s11, %s3267_s3 }
  0x18   :  { %p2590_p10 = pnand %p2588_p9, %p2585_p8 }
  0x1a   :  { %2593 = shalt.err (!%p2590_p10)
}
  0x1b   :  { %s2594_s16 = scalar_lea.vmem %s2753_s21, 256  ;;  %p2599_p12 = scmp.lt.s32.totalorder %s2753_s21, %s2753_s21 }
  0x1c   :  { %p2595_p11 = scmp.ne.s32.totalorder %s2753_s21, %s2594_s16  ;;  %p2600_p13 = scmp.lt.s32.totalorder %s2594_s16, %s2594_s16 }
  0x1e   :  { %p2601_p0 = por %p2600_p13, %p2599_p12 }
  0x20   :  { %p2602_p1 = pnand %p2601_p0, %p2595_p11 }
  0x22   :  { %2605 = shalt.err (!%p2602_p1)
}
  0x23   :  { %59 = dma.hbm_to_vmem [thread:$0]  %s3267_s3, 256, %s2753_s21, [#allocation9], %s2704_s30, %s2704_s30, %s2705_s6  }
  0x24   :  { %s2706_s18 = smov [#allocation2]   ;;  %s2707_s20 = smov [#allocation7]  }
  0x25   :  { %s19_s19 = sshll.u32 %s2706_s18, 4  ;;  %s44_s22 = sshll.u32 %s2707_s20, 4  ;;  %s20_s19 = int_to_ptr.vmem [resolvable:$true] %s19_s19  ;;  %s45_s22 = int_to_ptr.vmem [resolvable:$true] %s44_s22 }
  0x26   :  { %s2606_s25 = scalar_lea.hbm %s3264_s0, 128 }
  0x27   :  { %p2607_p2 = scmp.ne.s32.totalorder %s3264_s0, %s2606_s25  ;;  %p2610_p3 = scmp.lt.u32.totalorder %s2606_s25, %s3264_s0 }
  0x29   :  { %p2612_p4 = pnand %p2610_p3, %p2607_p2 }
  0x2b   :  { %2615 = shalt.err (!%p2612_p4)
}
  0x2c   :  { %s2616_s3 = scalar_lea.vmem %s20_s19, 128  ;;  %p2621_p6 = scmp.lt.s32.totalorder %s20_s19, %s20_s19 }
  0x2d   :  { %p2617_p5 = scmp.ne.s32.totalorder %s20_s19, %s2616_s3  ;;  %p2622_p7 = scmp.lt.s32.totalorder %s2616_s3, %s2616_s3 }
  0x2f   :  { %p2623_p8 = por %p2622_p7, %p2621_p6 }
  0x31   :  { %p2624_p9 = pnand %p2623_p8, %p2617_p5 }
  0x33   :  { %2627 = shalt.err (!%p2624_p9)
}
  0x34   :  { %25 = dma.hbm_to_vmem [thread:$0]  %s3264_s0, 128, %s20_s19, [#allocation3], %s2704_s30, %s2704_s30, %s2705_s6  }
  0x35   :  { %s2628_s10 = scalar_lea.hbm %s3266_s2, 16 }
  0x36   :  { %p2629_p10 = scmp.ne.s32.totalorder %s3266_s2, %s2628_s10  ;;  %p2632_p11 = scmp.lt.u32.totalorder %s2628_s10, %s3266_s2 }
  0x38   :  { %p2634_p12 = pnand %p2632_p11, %p2629_p10 }
  0x3a   :  { %2637 = shalt.err (!%p2634_p12)
}
  0x3b   :  { %s2638_s15 = scalar_lea.vmem %s45_s22, 16  ;;  %s2642_s16 = scalar_lea.vmem %s45_s22, 32 }
  0x3c   :  { %p2639_p13 = scmp.ne.s32.totalorder %s45_s22, %s2638_s15  ;;  %p2643_p0 = scmp.lt.s32.totalorder %s45_s22, %s45_s22 }
  0x3d   :  { %p2644_p1 = scmp.lt.s32.totalorder %s2642_s16, %s2638_s15 }
  0x3f   :  { %p2645_p2 = por %p2644_p1, %p2643_p0 }
  0x41   :  { %p2646_p3 = pnand %p2645_p2, %p2639_p13 }
  0x43   :  { %2649 = shalt.err (!%p2646_p3)
}
  0x44   :  { %47 = dma.hbm_to_vmem [thread:$0]  %s3266_s2, 16, %s45_s22, [#allocation6]  }
  0x45   :  { %s2708_s1 = smov [#allocation10]   ;;  %s2650_s20 = scalar_lea.hbm %s3268_s4, 16 }
  0x46   :  { %s66_s17 = sshll.u32 %s2708_s1, 4  ;;  %p2651_p4 = scmp.ne.s32.totalorder %s3268_s4, %s2650_s20  ;;  %s67_s17 = int_to_ptr.vmem [resolvable:$true] %s66_s17 }
  0x47   :  { %p2654_p5 = scmp.lt.u32.totalorder %s2650_s20, %s3268_s4 }
  0x49   :  { %p2656_p6 = pnand %p2654_p5, %p2651_p4 }
  0x4b   :  { %2659 = shalt.err (!%p2656_p6)
}
  0x4c   :  { %s2660_s27 = scalar_lea.vmem %s67_s17, 16  ;;  %s2664_s2 = scalar_lea.vmem %s67_s17, 32 }
  0x4d   :  { %p2661_p7 = scmp.ne.s32.totalorder %s67_s17, %s2660_s27  ;;  %p2665_p8 = scmp.lt.s32.totalorder %s67_s17, %s67_s17 }
  0x4e   :  { %p2666_p9 = scmp.lt.s32.totalorder %s2664_s2, %s2660_s27 }
  0x50   :  { %p2667_p10 = por %p2666_p9, %p2665_p8 }
  0x52   :  { %p2668_p11 = pnand %p2667_p10, %p2661_p7 }
  0x54   :  { %2671 = shalt.err (!%p2668_p11)
}
  0x55   :  { %69 = dma.hbm_to_vmem [thread:$0]  %s3268_s4, 16, %s67_s17, [#allocation9]  }
  0x56   :  { %2694 = dma.done.wait [#allocation3], 128  }
  0x57   :  { %2695 = vsyncadd [#allocation3], 4294967168 }
  0x58   :  { %2696 = dma.done.wait [#allocation6], 272  }
  0x59   :  { %2697 = vsyncadd [#allocation6], 4294967024 }
  0x5a   :  { %2698 = dma.done.wait [#allocation9], 272  }
  0x5b   :  { %2699 = vsyncadd [#allocation9], 4294967024  ;;  %v2709_v0 = vmov 0.0   ;;  %vm2710_vm0 = vmmov 0   ;;  %v2525_v1 = vld [vmem:[#allocation5] sm:$0xff]   ;;  %v2526_v2 = vld [vmem:[#allocation5 + $0x8] sm:$0xff]   ;;  %v186_v13 = vlaneseq }
  0x5c   :  { %2392 = vmatprep.subr.bf16.mxu0 %v2709_v0  ;;  %2396 = vmatprep.mubr.msk.bf16.mxu0 %vm2710_vm0, %v2709_v0  ;;  %v2527_v3 = vld [vmem:[#allocation2] sm:$0xff]   ;;  %vm116_vm1 = vcmask 261120   ;;  %v2305_v4 = vld [vmem:[#allocation7] ss:$0 sm:$0xff]  ;;  %s2711_s4 = smov 104   ;;  %s2712_s29 = smov 120  }
  0x5d   :  { %2400 = vmatprep.subr.bf16.mxu1 %v2709_v0  ;;  %2402 = vmatprep.mubr.msk.bf16.mxu1 %vm2710_vm0, %v2709_v0  ;;  %s2713_s3 = smov 112   ;;  %s2714_s21 = smov 96   ;;  %v2715_v11 = vmov 1983009808   ;;  %v2716_v14 = vmov 1934713408  }
  0x5e   :  { %2393 = vmatpush3.bf16.msra.mxu0 %v2525_v1  ;;  %v184_v12 = vunpack.c.l.s4 %v2715_v11  ;;  %v216_v15 = vunpack.c.l.s4 %v2716_v14  ;;  %v187_v17 = vshrl.u32 %v186_v13, 7  ;;  %v2717_v59 = vmov 0   ;;  %s2719_s7 = smov 8   ;;  %s2720_s8 = smov 24  }
  0x5f   :  { %2394 = vmatprep.subr.bf16.mxu0 %v2709_v0  ;;  %vm1057_vm2 = vcmask 64512   ;;  %vm1509_vm3 = vcmask 1043456   ;;  %vm2212_vm4 = vcmask 130048   ;;  %vm2215_vm5 = vcmask 195584   ;;  %s2721_s9 = smov [#allocation11]  }
  0x60   :  { %v185_v16 = vunpack.c.0.s8 %v184_v12  ;;  %v217_v22 = vunpack.c.0.s8 %v216_v15  ;;  %s2291_s10 = sshll.u32 %s2721_s9, 4  ;;  %s2292_s10 = int_to_ptr.vmem [resolvable:$true] %s2291_s10 }
  0x61   :  { %s2672_s11 = scalar_lea.vmem %s2292_s10, 256  ;;  %p2677_p13 = scmp.lt.s32.totalorder %s2292_s10, %s2292_s10 }
  0x62   :  { %2395 = vmatpush3.bf16.msra.mxu0 %v2526_v2  ;;  %v2853_v23 = vsub.s32 %v185_v16, %v187_v17  ;;  %v2859_v27 = vsub.s32 %v217_v22, %v187_v17  ;;  %p2673_p12 = scmp.ne.s32.totalorder %s2292_s10, %s2672_s11  ;;  %p2678_p0 = scmp.lt.s32.totalorder %s2672_s11, %s2672_s11 }
  0x63   :  { %2406 = vmatprep.subr.bf16.mxu0 %v2709_v0 }
  0x64   :  { %p2679_p1 = por %p2678_p0, %p2677_p13 }
  0x65   :  { %2397 = vmatmul.mubr.msk.bf16.vlgmr.msra.gmra.mrb[0].mxu0 %vm116_vm1, %v2527_v3 }
  0x66   :  { %2408 = vmatprep.mubr.msk.bf16.mxu0 %vm2710_vm0, %v2709_v0  ;;  %p2680_p2 = pnand %p2679_p1, %p2673_p12 }
 0x138   :  { %v154_v5 = vpop.f32.mrb[0].mxu0 }
 0x139   :  { %v2840_v6 = vadd.f32 %v2305_v4, %v154_v5  ;;  %v2398_v7 = vpop.f32.mrb[1].mxu0 }
 0x13a   :  { %v157_v8 = vpop.f32.mrb[2].mxu0 }
 0x13b   :  { %175 = vrot.lane.b32.xlu1 %v2840_v6, %s2711_s4  ;;  %163 = vrot.lane.b32.xlu0 %v2840_v6, %s2712_s29  ;;  %v2399_v9 = vpop.f32.mrb[3].mxu0  ;;  %v2844_v10 = vadd.f32 %v2305_v4, %v157_v8 }
 0x13f   :  { %169 = vrot.lane.b32.xlu0 %v2840_v6, %s2713_s3  ;;  %165 = vrot.lane.b32.xlu1 %v2844_v10, %s2712_s29 }
 0x143   :  { %171 = vrot.lane.b32.xlu0 %v2844_v10, %s2713_s3  ;;  %177 = vrot.lane.b32.xlu1 %v2844_v10, %s2711_s4 }
 0x147   :  { %457 = vrot.lane.b32.xlu0 %v2840_v6, %s2714_s21 }
 0x1ad   :  { %v176_v18 = vpop.permute.xlu1 %175  ;;  %v164_v19 = vpop.permute.xlu0 %163 }
 0x1ae   :  { %v197_v20 = vcombine.low %v164_v19, %v176_v18  ;;  %v198_v21 = vcombine.high %v164_v19, %v176_v18  ;;  %461 = vrot.lane.b32.xlu1 %v164_v19, %s2714_s21 }
 0x1b0   :  { %v205_v28 = vrot.slane %v197_v20, %v2853_v23  ;;  %v212_v29 = vrot.slane %v198_v21, %v2853_v23 }
 0x1b1   :  { %v170_v24 = vpop.permute.xlu0 %169  ;;  %v2865_v32 = vpop.permute.xlu1 %165 }
 0x1b2   :  { %v181_v25 = vcombine.low %v2840_v6, %v170_v24  ;;  %v182_v26 = vcombine.high %v2840_v6, %v170_v24  ;;  %465 = vrot.lane.b32.xlu0 %v170_v24, %s2714_s21  ;;  %469 = vrot.lane.b32.xlu1 %v176_v18, %s2714_s21 }
 0x1b4   :  { %v189_v30 = vrot.slane %v181_v25, %v2853_v23  ;;  %v196_v31 = vrot.slane %v182_v26, %v2853_v23 }
 0x1b5   :  { %v2875_v41 = vpop.permute.xlu0 %171  ;;  %v2881_v46 = vpop.permute.xlu1 %177 }
 0x1b6   :  { %v213_v33 = vcombine.low %v189_v30, %v205_v28  ;;  %v214_v34 = vcombine.high %v189_v30, %v205_v28  ;;  %v229_v35 = vcombine.low %v196_v31, %v212_v29  ;;  %v230_v36 = vcombine.high %v196_v31, %v212_v29  ;;  %459 = vrot.lane.b32.xlu0 %v2844_v10, %s2714_s21 }
 0x1b7   :  { %463 = vrot.lane.b32.xlu1 %v2865_v32, %s2714_s21  ;;  %v249_v7 = vcombine.low %v2844_v10, %v2875_v41  ;;  %v265_v8 = vcombine.low %v2865_v32, %v2881_v46  ;;  %v250_v12 = vcombine.high %v2844_v10, %v2875_v41  ;;  %v266_v14 = vcombine.high %v2865_v32, %v2881_v46 }
 0x1b8   :  { %v221_v37 = vrot.slane %v213_v33, %v2859_v27  ;;  %v228_v38 = vrot.slane %v214_v34, %v2859_v27  ;;  %v237_v39 = vrot.slane %v229_v35, %v2859_v27  ;;  %v244_v40 = vrot.slane %v230_v36, %v2859_v27 }
 0x1b9   :  { %v458_v9 = vpop.permute.xlu0 %457  ;;  %v257_v13 = vrot.slane %v249_v7, %v2853_v23  ;;  %v273_v15 = vrot.slane %v265_v8, %v2853_v23  ;;  %v264_v26 = vrot.slane %v250_v12, %v2853_v23  ;;  %v280_v28 = vrot.slane %v266_v14, %v2853_v23 }
 0x1ba   :  { %v245_v42 = vcombine.high %v221_v37, %v2709_v0  ;;  %v246_v43 = vcombine.high %v228_v38, %v2709_v0  ;;  %v247_v44 = vcombine.high %v237_v39, %v2709_v0  ;;  %v248_v45 = vcombine.high %v244_v40, %v2709_v0  ;;  %467 = vrot.lane.b32.xlu0 %v2875_v41, %s2714_s21 }
 0x1bb   :  { %v2310_v47 = vpack.c.bf16 %v237_v39, %v221_v37  ;;  %v2311_v48 = vpack.c.bf16 %v244_v40, %v228_v38  ;;  %471 = vrot.lane.b32.xlu1 %v2881_v46, %s2714_s21  ;;  %v281_v29 = vcombine.low %v257_v13, %v273_v15  ;;  %v282_v30 = vcombine.high %v257_v13, %v273_v15 }
 0x1bc   :  { %v2312_v49 = vpack.c.bf16 %v247_v44, %v245_v42  ;;  %v2313_v50 = vpack.c.bf16 %v248_v45, %v246_v43  ;;  %v297_v45 = vcombine.low %v264_v26, %v280_v28 }
 0x1bd   :  { %v340_v51 = vrot.slane %v2310_v47, %v2853_v23  ;;  %v348_v52 = vrot.slane %v2311_v48, %v2853_v23  ;;  %v2945_v43 = vrot.slane %v281_v29, %v2859_v27  ;;  %v2948_v44 = vrot.slane %v282_v30, %v2859_v27 }
 0x1be   :  { %757 = vrot.lane.b32.xlu0 %v2840_v6, %s2704_s30  ;;  %v365_v53 = vrot.slane %v2312_v49, %v2853_v23  ;;  %v373_v55 = vrot.slane %v2313_v50, %v2853_v23  ;;  %v298_v47 = vcombine.high %v264_v26, %v280_v28 }
 0x1bf   :  { %761 = vrot.lane.b32.xlu1 %v164_v19, %s2704_s30  ;;  %v349_v54 = vcombine.low %v340_v51, %v348_v52  ;;  %v2970_v26 = vcombine.high %v2945_v43, %v2709_v0  ;;  %v2974_v28 = vcombine.high %v2948_v44, %v2709_v0 }
 0x1c0   :  { %v374_v57 = vcombine.low %v365_v53, %v373_v55 }
 0x1c1   :  { %v2895_v56 = vrot.slane %v349_v54, %v2859_v27 }
 0x1c2   :  { %765 = vrot.lane.b32.xlu0 %v170_v24, %s2704_s30  ;;  %v2900_v58 = vrot.slane %v374_v57, %v2859_v27 }
 0x1c3   :  { %769 = vrot.lane.b32.xlu1 %v176_v18, %s2704_s30  ;;  %v2904_v60 = vcombine.high %v2895_v56, %v2717_v59  ;;  %v436_v62 = vshrl.u32 %v2895_v56, 16 }
 0x1c4   :  { %v435_v61 = vpack.i.b16 %v2900_v58, %v2895_v56  ;;  %v437_v63 = vshrl.u32 %v2900_v58, 16  ;;  %v2912_v1 = vcombine.high %v2900_v58, %v2717_v59 }
 0x1c5   :  { %v442_v4 = vshrl.u32 %v2904_v60, 16 }
 0x1c6   :  { %v2916_v2 = vpack.i.b16 %v437_v63, %v436_v62  ;;  %v441_v3 = vpack.i.b16 %v2912_v1, %v2904_v60  ;;  %v443_v5 = vshrl.u32 %v2912_v1, 16 }
 0x1c7   :  { %759 = vrot.lane.b32.xlu1 %v2844_v10, %s2704_s30 }
 0x1c8   :  { %v2922_v6 = vpack.i.b16 %v443_v5, %v442_v4 }
 0x220   :  { %v462_v11 = vpop.permute.xlu1 %461 }
 0x224   :  { %v466_v16 = vpop.permute.xlu0 %465  ;;  %v470_v17 = vpop.permute.xlu1 %469 }
 0x225   :  { %v481_v18 = vcombine.low %v458_v9, %v466_v16  ;;  %v482_v19 = vcombine.high %v458_v9, %v466_v16  ;;  %v497_v20 = vcombine.low %v462_v11, %v470_v17  ;;  %v498_v21 = vcombine.high %v462_v11, %v470_v17 }
 0x227   :  { %v489_v22 = vrot.slane %v481_v18, %v2853_v23  ;;  %v496_v24 = vrot.slane %v482_v19, %v2853_v23  ;;  %v505_v25 = vrot.slane %v497_v20, %v2853_v23  ;;  %v512_v10 = vrot.slane %v498_v21, %v2853_v23 }
 0x228   :  { %v460_v31 = vpop.permute.xlu0 %459  ;;  %v2963_v19 = vrot.slane %v297_v45, %v2859_v27  ;;  %v2966_v20 = vrot.slane %v298_v47, %v2859_v27 }
 0x229   :  { %v513_v33 = vcombine.low %v489_v22, %v505_v25  ;;  %v514_v34 = vcombine.high %v489_v22, %v505_v25  ;;  %v529_v35 = vcombine.low %v496_v24, %v512_v10  ;;  %v530_v36 = vcombine.high %v496_v24, %v512_v10  ;;  %v464_v37 = vpop.permute.xlu1 %463 }
 0x22b   :  { %v521_v38 = vrot.slane %v513_v33, %v2859_v27  ;;  %v528_v39 = vrot.slane %v514_v34, %v2859_v27  ;;  %v537_v40 = vrot.slane %v529_v35, %v2859_v27  ;;  %v544_v42 = vrot.slane %v530_v36, %v2859_v27 }
 0x22c   :  { %v468_v48 = vpop.permute.xlu0 %467 }
 0x22d   :  { %v545_v49 = vcombine.high %v521_v38, %v2709_v0  ;;  %v546_v50 = vcombine.high %v528_v39, %v2709_v0  ;;  %v547_v51 = vcombine.high %v537_v40, %v2709_v0  ;;  %v548_v52 = vcombine.high %v544_v42, %v2709_v0  ;;  %v472_v53 = vpop.permute.xlu1 %471 }
 0x22e   :  { %v2318_v54 = vpack.c.bf16 %v537_v40, %v521_v38  ;;  %v2319_v55 = vpack.c.bf16 %v544_v42, %v528_v39  ;;  %v549_v57 = vcombine.low %v460_v31, %v468_v48  ;;  %v550_v62 = vcombine.high %v460_v31, %v468_v48 }
 0x22f   :  { %v2320_v63 = vpack.c.bf16 %v547_v51, %v545_v49  ;;  %v2321_v4 = vpack.c.bf16 %v548_v52, %v546_v50  ;;  %v565_v5 = vcombine.low %v464_v37, %v472_v53  ;;  %v566_v7 = vcombine.high %v464_v37, %v472_v53 }
 0x230   :  { %v557_v8 = vrot.slane %v549_v57, %v2853_v23  ;;  %v564_v9 = vrot.slane %v550_v62, %v2853_v23  ;;  %v758_v11 = vpop.permute.xlu0 %757  ;;  %v640_v12 = vrot.slane %v2318_v54, %v2853_v23  ;;  %v648_v13 = vrot.slane %v2319_v55, %v2853_v23 }
 0x231   :  { %v573_v14 = vrot.slane %v565_v5, %v2853_v23  ;;  %v580_v15 = vrot.slane %v566_v7, %v2853_v23  ;;  %v762_v16 = vpop.permute.xlu1 %761  ;;  %v665_v17 = vrot.slane %v2320_v63, %v2853_v23  ;;  %v673_v18 = vrot.slane %v2321_v4, %v2853_v23 }
 0x232   :  { %v649_v21 = vcombine.low %v640_v12, %v648_v13  ;;  %v315_v54 = vcombine.high %v2963_v19, %v2709_v0  ;;  %v316_v63 = vcombine.high %v2966_v20, %v2709_v0 }
 0x233   :  { %v581_v22 = vcombine.low %v557_v8, %v573_v14  ;;  %v582_v24 = vcombine.high %v557_v8, %v573_v14  ;;  %v597_v25 = vcombine.low %v564_v9, %v580_v15  ;;  %v598_v10 = vcombine.high %v564_v9, %v580_v15 }
 0x234   :  { %v766_v29 = vpop.permute.xlu0 %765  ;;  %v656_v30 = vrot.slane %v649_v21, %v2859_v27  ;;  %v674_v31 = vcombine.low %v665_v17, %v673_v18 }
 0x235   :  { %v589_v33 = vrot.slane %v581_v22, %v2859_v27  ;;  %v596_v34 = vrot.slane %v582_v24, %v2859_v27  ;;  %v605_v35 = vrot.slane %v597_v25, %v2859_v27  ;;  %v612_v36 = vrot.slane %v598_v10, %v2859_v27  ;;  %v770_v37 = vpop.permute.xlu1 %769 }
 0x236   :  { %v781_v38 = vcombine.low %v758_v11, %v766_v29  ;;  %v782_v39 = vcombine.high %v758_v11, %v766_v29  ;;  %v797_v40 = vcombine.low %v762_v16, %v770_v37  ;;  %v798_v42 = vcombine.high %v762_v16, %v770_v37 }
 0x237   :  { %v613_v45 = vcombine.high %v589_v33, %v2709_v0  ;;  %v614_v47 = vcombine.high %v596_v34, %v2709_v0  ;;  %v615_v48 = vcombine.high %v605_v35, %v2709_v0  ;;  %v616_v49 = vcombine.high %v612_v36, %v2709_v0 }
 0x238   :  { %v2322_v50 = vpack.c.bf16 %v605_v35, %v589_v33  ;;  %v2323_v51 = vpack.c.bf16 %v612_v36, %v596_v34  ;;  %v789_v52 = vrot.slane %v781_v38, %v2853_v23  ;;  %v796_v53 = vrot.slane %v782_v39, %v2853_v23 }
 0x239   :  { %v2324_v55 = vpack.c.bf16 %v615_v48, %v613_v45  ;;  %v805_v57 = vrot.slane %v797_v40, %v2853_v23  ;;  %v812_v62 = vrot.slane %v798_v42, %v2853_v23  ;;  %v2325_v5 = vpack.c.bf16 %v616_v49, %v614_v47 }
 0x23a   :  { %v690_v4 = vrot.slane %v2322_v50, %v2853_v23  ;;  %v681_v7 = vrot.slane %v674_v31, %v2859_v27  ;;  %v698_v8 = vrot.slane %v2323_v51, %v2853_v23  ;;  %v736_v12 = vshrl.u32 %v656_v30, 16 }
 0x23b   :  { %v813_v9 = vcombine.low %v789_v52, %v805_v57  ;;  %v814_v11 = vcombine.high %v789_v52, %v805_v57  ;;  %v829_v13 = vcombine.low %v796_v53, %v812_v62  ;;  %v830_v14 = vcombine.high %v796_v53, %v812_v62 }
 0x23c   :  { %v735_v15 = vpack.i.b16 %v681_v7, %v656_v30  ;;  %v737_v16 = vshrl.u32 %v681_v7, 16  ;;  %v715_v17 = vrot.slane %v2324_v55, %v2853_v23  ;;  %v682_v22 = vcombine.high %v681_v7, %v2717_v59 }
 0x23d   :  { %v821_v18 = vrot.slane %v813_v9, %v2859_v27  ;;  %v828_v21 = vrot.slane %v814_v11, %v2859_v27  ;;  %v837_v24 = vrot.slane %v829_v13, %v2859_v27  ;;  %v844_v25 = vrot.slane %v830_v14, %v2859_v27 }
 0x23e   :  { %v1062_v10 = vsel %vm1057_vm2, %v735_v15, 0  ;;  %v738_v29 = vpack.i.b16 %v737_v16, %v736_v12  ;;  %v723_v31 = vrot.slane %v2325_v5, %v2853_v23  ;;  %v657_v35 = vcombine.high %v656_v30, %v2717_v59 }
 0x23f   :  { %v845_v33 = vcombine.high %v821_v18, %v2709_v0  ;;  %v846_v34 = vcombine.high %v828_v21, %v2709_v0  ;;  %2401 = vmatpush3.bf16.xpose.msra.mxu1 %v1062_v10  ;;  %v847_v36 = vcombine.high %v837_v24, %v2709_v0  ;;  %v848_v37 = vcombine.high %v844_v25, %v2709_v0 }
 0x240   :  { %v2326_v38 = vpack.c.bf16 %v837_v24, %v821_v18  ;;  %v2327_v39 = vpack.c.bf16 %v844_v25, %v828_v21  ;;  %2412 = vmatprep.subr.bf16.mxu1 %v2709_v0  ;;  %v2316_v40 = vpack.c.bf16 %v315_v54, %v2970_v26  ;;  %v1108_v42 = vsel %vm1057_vm2, %v738_v29, 0 }
 0x241   :  { %v741_v45 = vpack.i.b16 %v682_v22, %v657_v35  ;;  %v743_v47 = vshrl.u32 %v682_v22, 16  ;;  %v2328_v50 = vpack.c.bf16 %v847_v36, %v845_v33  ;;  %v2329_v30 = vpack.c.bf16 %v848_v37, %v846_v34  ;;  %2407 = vmatpush3.bf16.xpose.msra.mxu0 %v1108_v42 }
 0x242   :  { %v940_v48 = vrot.slane %v2326_v38, %v2853_v23  ;;  %v948_v49 = vrot.slane %v2327_v39, %v2853_v23  ;;  %v2317_v51 = vpack.c.bf16 %v316_v63, %v2974_v28  ;;  %2418 = vmatprep.subr.bf16.mxu0 %v2709_v0  ;;  %v742_v52 = vshrl.u32 %v657_v35, 16 }
 0x243   :  { %v699_v53 = vcombine.low %v690_v4, %v698_v8  ;;  %v724_v55 = vcombine.low %v715_v17, %v723_v31  ;;  %v965_v26 = vrot.slane %v2328_v50, %v2853_v23  ;;  %v973_v54 = vrot.slane %v2329_v30, %v2853_v23 }
 0x244   :  { %v949_v57 = vcombine.low %v940_v48, %v948_v49  ;;  %v2314_v62 = vpack.c.bf16 %v2963_v19, %v2945_v43  ;;  %v2315_v5 = vpack.c.bf16 %v2966_v20, %v2948_v44  ;;  %v744_v7 = vpack.i.b16 %v743_v47, %v742_v52 }
 0x245   :  { %v731_v9 = vrot.slane %v724_v55, %v2859_v27  ;;  %v1154_v28 = vsel %vm1057_vm2, %v741_v45, 0  ;;  %v974_v4 = vcombine.low %v965_v26, %v973_v54  ;;  %v415_v8 = vrot.slane %v2316_v40, %v2853_v23 }
 0x246   :  { %2403 = vmatmul.mubr.msk.bf16.vlgmr.msra.gmra.mrb[0].mxu1 %vm1057_vm2, %v435_v61  ;;  %v3029_v63 = vrot.slane %v949_v57, %v2859_v27  ;;  %v423_v43 = vrot.slane %v2317_v51, %v2853_v23  ;;  %v706_v44 = vrot.slane %v699_v53, %v2859_v27  ;;  %v390_v61 = vrot.slane %v2314_v62, %v2853_v23 }
 0x247   :  { %2413 = vmatpush3.bf16.xpose.msra.mxu1 %v1154_v28  ;;  %2414 = vmatprep.mubr.msk.bf16.mxu1 %vm2710_vm0, %v2709_v0  ;;  %v3038_v56 = vrot.slane %v974_v4, %v2859_v27  ;;  %v398_v19 = vrot.slane %v2315_v5, %v2853_v23  ;;  %v1200_v20 = vsel %vm1057_vm2, %v744_v7, 0  ;;  %v749_v11 = vshrl.u32 %v731_v9, 16 }
 0x248   :  { %2424 = vmatprep.subr.bf16.mxu1 %v2709_v0  ;;  %v3042_v58 = vcombine.high %v3029_v63, %v2717_v59  ;;  %2409 = vmatmul.mubr.msk.bf16.vlgmr.msra.gmra.mrb[4].mxu0 %vm1057_vm2, %v2916_v2  ;;  %v747_v12 = vpack.i.b16 %v731_v9, %v706_v44  ;;  %v748_v14 = vshrl.u32 %v706_v44, 16  ;;  %v424_v15 = vcombine.low %v415_v8, %v423_v43 }
 0x249   :  { %2419 = vmatpush3.bf16.xpose.msra.mxu0 %v1200_v20  ;;  %2420 = vmatprep.mubr.msk.bf16.mxu0 %vm2710_vm0, %v2709_v0  ;;  %v3053_v13 = vcombine.high %v3038_v56, %v2717_v59  ;;  %v399_v18 = vcombine.low %v390_v61, %v398_v19  ;;  %v732_v22 = vcombine.high %v731_v9, %v2717_v59  ;;  %v1037_v45 = vshrl.u32 %v3038_v56, 16 }
 0x24a   :  { %2430 = vmatprep.subr.bf16.mxu0 %v2709_v0  ;;  %v1042_v2 = vshrl.u32 %v3042_v58, 16  ;;  %v750_v21 = vpack.i.b16 %v749_v11, %v748_v14  ;;  %v1246_v24 = vsel %vm1057_vm2, %v747_v12, 0  ;;  %v431_v10 = vrot.slane %v424_v15, %v2859_v27 }
 0x24b   :  { %v1041_v16 = vpack.i.b16 %v3053_v13, %v3042_v58  ;;  %v1043_v17 = vshrl.u32 %v3053_v13, 16  ;;  %v707_v29 = vcombine.high %v706_v44, %v2717_v59  ;;  %v406_v1 = vrot.slane %v399_v18, %v2859_v27 }
 0x24c   :  { %v1292_v60 = vsel %vm1057_vm2, %v750_v21, 0  ;;  %v449_v33 = vshrl.u32 %v431_v10, 16  ;;  %v432_v39 = vcombine.high %v431_v10, %v2717_v59  ;;  %v1035_v47 = vpack.i.b16 %v3038_v56, %v3029_v63 }
 0x24d   :  { %v3066_v25 = vpack.i.b16 %v1043_v17, %v1042_v2  ;;  %v753_v31 = vpack.i.b16 %v732_v22, %v707_v29  ;;  %v754_v34 = vshrl.u32 %v707_v29, 16  ;;  %v447_v35 = vpack.i.b16 %v431_v10, %v406_v1 }
 0x24e   :  { %2415 = vmatmul.mubr.msk.bf16.vlgmr.msra.gmra.mrb[4].mxu1 %vm1057_vm2, %v441_v3  ;;  %v755_v3 = vshrl.u32 %v732_v22, 16  ;;  %v448_v36 = vshrl.u32 %v406_v1, 16  ;;  %v407_v42 = vcombine.high %v406_v1, %v2717_v59  ;;  %v455_v48 = vshrl.u32 %v432_v39, 16 }
 0x24f   :  { %2425 = vmatpush3.bf16.xpose.msra.mxu1 %v1246_v24  ;;  %2426 = vmatprep.mubr.msk.bf16.mxu1 %vm2710_vm0, %v2709_v0  ;;  %v1036_v49 = vshrl.u32 %v3029_v63, 16  ;;  %v1511_v52 = vsel %vm1509_vm3, %v1035_v47, 0 }
 0x250   :  { %2436 = vmatprep.subr.bf16.mxu1 %v2709_v0  ;;  %2421 = vmatmul.mubr.msk.bf16.vlgmr.msra.gmra.mrb[8].mxu0 %vm1057_vm2, %v2922_v6  ;;  %v756_v37 = vpack.i.b16 %v755_v3, %v754_v34  ;;  %v1338_v6 = vsel %vm1057_vm2, %v753_v31, 0  ;;  %v450_v38 = vpack.i.b16 %v449_v33, %v448_v36  ;;  %v453_v50 = vpack.i.b16 %v432_v39, %v407_v42  ;;  %v760_v39 = vpop.permute.xlu1 %759 }
 0x251   :  { %2431 = vmatpush3.bf16.xpose.msra.mxu0 %v1292_v60  ;;  %2432 = vmatprep.mubr.msk.bf16.mxu0 %vm2710_vm0, %v2709_v0  ;;  %v454_v30 = vshrl.u32 %v407_v42, 16  ;;  %v1038_v51 = vpack.i.b16 %v1037_v45, %v1036_v49 }
 0x252   :  { %2442 = vmatprep.subr.bf16.mxu0 %v2709_v0  ;;  %v1384_v40 = vsel %vm1057_vm2, %v756_v37, 0 }
 0x253   :  { %v456_v53 = vpack.i.b16 %v455_v48, %v454_v30  ;;  %v1557_v55 = vsel %vm1509_vm3, %v1038_v51, 0 }
 0x256   :  { %2427 = vmatmul.mubr.msk.bf16.vlgmr.msra.gmra.mrb[8].mxu1 %vm1057_vm2, %v447_v35 }
 0x257   :  { %2437 = vmatpush3.bf16.xpose.msra.mxu1 %v1338_v6  ;;  %2438 = vmatprep.mubr.msk.bf16.mxu1 %vm2710_vm0, %v2709_v0 }
 0x258   :  { %2448 = vmatprep.subr.bf16.mxu1 %v2709_v0  ;;  %2433 = vmatmul.mubr.msk.bf16.vlgmr.msra.gmra.mrb[12].mxu0 %vm1057_vm2, %v450_v38 }
 0x259   :  { %2443 = vmatpush3.bf16.xpose.msra.mxu0 %v1384_v40  ;;  %2444 = vmatprep.mubr.msk.bf16.mxu0 %vm2710_vm0, %v2709_v0 }
 0x25a   :  { %2454 = vmatprep.subr.bf16.mxu0 %v2709_v0 }
 0x25e   :  { %2439 = vmatmul.mubr.msk.bf16.vlgmr.msra.gmra.mrb[12].mxu1 %vm1057_vm2, %v453_v50 }
 0x25f   :  { %2449 = vmatpush3.bf16.msra.mxu1 %v1511_v52  ;;  %2450 = vmatprep.mubr.msk.bf16.mxu1 %vm2710_vm0, %v2709_v0 }
 0x260   :  { %2460 = vmatprep.subr.bf16.mxu1 %v2709_v0  ;;  %2445 = vmatmul.mubr.msk.bf16.vlgmr.msra.gmra.mrb[16].mxu0 %vm1057_vm2, %v456_v53 }
 0x261   :  { %2455 = vmatpush3.bf16.msra.mxu0 %v1557_v55  ;;  %2456 = vmatprep.mubr.msk.bf16.mxu0 %vm2710_vm0, %v2709_v0 }
 0x262   :  { %2466 = vmatprep.subr.bf16.mxu0 %v2709_v0 }
 0x319   :  { %v1098_v26 = vpop.f32.mrb[0].mxu1 }
 0x31a   :  { %v2404_v54 = vpop.f32.mrb[1].mxu1  ;;  %v1426_v57 = vsel %vm1057_vm2, %v1098_v26, -inf }
 0x31b   :  { %1427 = vmax.xlane.f32.xlu0 %v1426_v57  ;;  %v1101_v62 = vpop.f32.mrb[2].mxu1  ;;  %v1144_v5 = vpop.f32.mrb[4].mxu0 }
 0x31c   :  { %v2405_v7 = vpop.f32.mrb[3].mxu1  ;;  %v2410_v9 = vpop.f32.mrb[5].mxu0  ;;  %v1429_v28 = vsel %vm1057_vm2, %v1144_v5, -inf }
 0x31d   :  { %1430 = vmax.xlane.f32.xlu1 %v1429_v28  ;;  %v1147_v63 = vpop.f32.mrb[6].mxu0  ;;  %v1603_v7 = vsel %vm1509_vm3, %v1041_v16, 0 }
 0x31e   :  { %v2411_v4 = vpop.f32.mrb[7].mxu0 }
 0x31f   :  { %v1649_v4 = vsel %vm1509_vm3, %v3066_v25, 0 }
 0x321   :  { %v1190_v8 = vpop.f32.mrb[4].mxu1 }
 0x322   :  { %v2416_v43 = vpop.f32.mrb[5].mxu1  ;;  %v1432_v44 = vsel %vm1057_vm2, %v1190_v8, -inf }
 0x323   :  { %1433 = vmax.xlane.f32.xlu0 %v1432_v44  ;;  %v1193_v56 = vpop.f32.mrb[6].mxu1  ;;  %v1236_v61 = vpop.f32.mrb[8].mxu0 }
 0x324   :  { %v2417_v19 = vpop.f32.mrb[7].mxu1  ;;  %v2422_v20 = vpop.f32.mrb[9].mxu0  ;;  %v1435_v11 = vsel %vm1057_vm2, %v1236_v61, -inf }
 0x325   :  { %1436 = vmax.xlane.f32.xlu1 %v1435_v11  ;;  %v1239_v12 = vpop.f32.mrb[10].mxu0 }
 0x326   :  { %v2423_v14 = vpop.f32.mrb[11].mxu0 }
 0x329   :  { %v1282_v15 = vpop.f32.mrb[8].mxu1 }
 0x32a   :  { %v2428_v2 = vpop.f32.mrb[9].mxu1  ;;  %v1438_v17 = vsel %vm1057_vm2, %v1282_v15, -inf }
 0x32b   :  { %1439 = vmax.xlane.f32.xlu0 %v1438_v17  ;;  %v1285_v18 = vpop.f32.mrb[10].mxu1  ;;  %v3111_v21 = vpop.f32.mrb[12].mxu0 }
 0x32c   :  { %v2429_v22 = vpop.f32.mrb[11].mxu1  ;;  %v2434_v24 = vpop.f32.mrb[13].mxu0  ;;  %v1441_v29 = vsel %vm1057_vm2, %v3111_v21, -inf }
 0x32d   :  { %v1331_v10 = vpop.f32.mrb[14].mxu0 }
 0x32e   :  { %v2435_v60 = vpop.f32.mrb[15].mxu0 }
 0x32f   :  { %1442 = vmax.xlane.f32.xlu0 %v1441_v29 }
 0x331   :  { %v3115_v1 = vpop.f32.mrb[12].mxu1 }
 0x332   :  { %v2440_v3 = vpop.f32.mrb[13].mxu1  ;;  %v1444_v38 = vsel %vm1057_vm2, %v3115_v1, -inf }
 0x333   :  { %v1377_v31 = vpop.f32.mrb[14].mxu1  ;;  %v3117_v33 = vpop.f32.mrb[16].mxu0 }
 0x334   :  { %v2441_v34 = vpop.f32.mrb[15].mxu1  ;;  %v2446_v35 = vpop.f32.mrb[17].mxu0  ;;  %v1447_v6 = vsel %vm1057_vm2, %v3117_v33, -inf }
 0x335   :  { %v1423_v36 = vpop.f32.mrb[18].mxu0 }
 0x336   :  { %767 = vrot.lane.b32.xlu1 %v2875_v41, %s2704_s30  ;;  %v2447_v37 = vpop.f32.mrb[19].mxu0 }
 0x33a   :  { %771 = vrot.lane.b32.xlu1 %v2881_v46, %s2704_s30 }
 0x345   :  { %763 = vrot.lane.b32.xlu0 %v2865_v32, %s2704_s30  ;;  %s2718_s30 = smov 16  }
 0x35e   :  { %1448 = vmax.xlane.f32.xlu1 %v1447_v6 }
 0x364   :  { %1445 = vmax.xlane.f32.xlu0 %v1444_v38 }
 0x3a8   :  { %v1428_v40 = vpop.xlane.xlu0 %1427 }
 0x3a9   :  { %v1450_v42 = vsub.f32 %v1098_v26, %v1428_v40 }
 0x3aa   :  { %v1431_v41 = vpop.xlane.xlu1 %1430 }
 0x3ab   :  { %v1458_v45 = vmul.f32 1.442695, %v1450_v42  ;;  %v1451_v47 = vsub.f32 %v1144_v5, %v1431_v41 }
 0x3ad   :  { %2530 = vpow2.f32 %v1458_v45  ;;  %v1460_v48 = vmul.f32 1.442695, %v1451_v47 }
 0x3af   :  { %2532 = vpow2.f32 %v1460_v48 }
 0x3b0   :  { %v1434_v46 = vpop.xlane.xlu0 %1433 }
 0x3b1   :  { %v1452_v49 = vsub.f32 %v1190_v8, %v1434_v46 }
 0x3b2   :  { %v1437_v50 = vpop.xlane.xlu1 %1436 }
 0x3b3   :  { %v1462_v32 = vmul.f32 1.442695, %v1452_v49  ;;  %v1453_v30 = vsub.f32 %v1236_v61, %v1437_v50 }
 0x3b5   :  { %2534 = vpow2.f32 %v1462_v32  ;;  %v1464_v51 = vmul.f32 1.442695, %v1453_v30 }
 0x3b6   :  { %v768_v62 = vpop.permute.xlu1 %767 }
 0x3b7   :  { %v2531_v52 = vpop.eup %2530  ;;  %2536 = vpow2.f32 %v1464_v51  ;;  %v849_v58 = vcombine.low %v760_v39, %v768_v62  ;;  %v850_v13 = vcombine.high %v760_v39, %v768_v62 }
 0x3b8   :  { %v1440_v53 = vpop.xlane.xlu0 %1439  ;;  %v1474_v55 = vsel %vm1057_vm2, %v2531_v52, 0.0  ;;  %v1498_v26 = vpack.c.bf16 %v2531_v52, %v2531_v52 }
 0x3b9   :  { %v1454_v54 = vsub.f32 %v1282_v15, %v1440_v53  ;;  %1475 = vadd.xlane.f32.xlu0 %v1474_v55  ;;  %v2533_v57 = vpop.eup %2532  ;;  %v857_v12 = vrot.slane %v849_v58, %v2853_v23  ;;  %v864_v14 = vrot.slane %v850_v13, %v2853_v23 }
 0x3ba   :  { %2451 = vmatmul.mubr.msk.bf16.vlgmr.msra.gmra.mrb[16].mxu1 %vm1057_vm2, %v1498_v26  ;;  %v1499_v9 = vpack.c.bf16 %v2533_v57, %v2533_v57  ;;  %v1477_v63 = vsel %vm1057_vm2, %v2533_v57, 0.0  ;;  %v772_v44 = vpop.permute.xlu1 %771 }
 0x3bb   :  { %v1466_v5 = vmul.f32 1.442695, %v1454_v54  ;;  %2461 = vmatpush3.bf16.msra.mxu1 %v1603_v7  ;;  %2462 = vmatprep.mubr.msk.bf16.mxu1 %vm2710_vm0, %v2709_v0 }
 0x3bc   :  { %v1443_v28 = vpop.xlane.xlu0 %1442  ;;  %2457 = vmatmul.mubr.msk.bf16.vlgmr.msra.gmra.mrb[20].mxu0 %vm1057_vm2, %v1499_v9  ;;  %2472 = vmatprep.subr.bf16.mxu1 %v2709_v0 }
 0x3bd   :  { %2538 = vpow2.f32 %v1466_v5  ;;  %v1455_v8 = vsub.f32 %v3111_v21, %v1443_v28  ;;  %1478 = vadd.xlane.f32.xlu0 %v1477_v63  ;;  %2467 = vmatpush3.bf16.msra.mxu0 %v1649_v4 }
 0x3be   :  { %2468 = vmatprep.mubr.msk.bf16.mxu0 %vm2710_vm0, %v2709_v0  ;;  %2478 = vmatprep.subr.bf16.mxu0 %v2709_v0 }
 0x3bf   :  { %v2535_v16 = vpop.eup %2534  ;;  %v1468_v43 = vmul.f32 1.442695, %v1455_v8 }
 0x3c0   :  { %v764_v56 = vpop.permute.xlu0 %763  ;;  %v1480_v61 = vsel %vm1057_vm2, %v2535_v16, 0.0  ;;  %v1500_v25 = vpack.c.bf16 %v2535_v16, %v2535_v16 }
 0x3c1   :  { %2540 = vpow2.f32 %v1468_v43  ;;  %v865_v19 = vcombine.low %v764_v56, %v772_v44  ;;  %v866_v20 = vcombine.high %v764_v56, %v772_v44  ;;  %1481 = vadd.xlane.f32.xlu1 %v1480_v61  ;;  %v2537_v11 = vpop.eup %2536 }
 0x3c2   :  { %2463 = vmatmul.mubr.msk.bf16.vlgmr.msra.gmra.mrb[20].mxu1 %vm1057_vm2, %v1500_v25  ;;  %v1483_v17 = vsel %vm1057_vm2, %v2537_v11, 0.0  ;;  %v1501_v18 = vpack.c.bf16 %v2537_v11, %v2537_v11 }
 0x3c3   :  { %v873_v15 = vrot.slane %v865_v19, %v2853_v23  ;;  %v880_v2 = vrot.slane %v866_v20, %v2853_v23  ;;  %1484 = vadd.xlane.f32.xlu0 %v1483_v17  ;;  %2474 = vmatprep.mubr.msk.bf16.mxu1 %vm2710_vm0, %v2709_v0 }
 0x3c4   :  { %2469 = vmatmul.mubr.msk.bf16.vlgmr.msra.gmra.mrb[24].mxu0 %vm1057_vm2, %v1501_v18 }
 0x3c5   :  { %v881_v21 = vcombine.low %v857_v12, %v873_v15  ;;  %v882_v22 = vcombine.high %v857_v12, %v873_v15  ;;  %v897_v24 = vcombine.low %v864_v14, %v880_v2  ;;  %v898_v10 = vcombine.high %v864_v14, %v880_v2  ;;  %2480 = vmatprep.mubr.msk.bf16.mxu0 %vm2710_vm0, %v2709_v0 }
 0x3c7   :  { %v2539_v29 = vpop.eup %2538  ;;  %v889_v60 = vrot.slane %v881_v21, %v2859_v27  ;;  %v896_v3 = vrot.slane %v882_v22, %v2859_v27  ;;  %v905_v31 = vrot.slane %v897_v24, %v2859_v27  ;;  %v912_v34 = vrot.slane %v898_v10, %v2859_v27 }
 0x3c8   :  { %v1486_v35 = vsel %vm1057_vm2, %v2539_v29, 0.0  ;;  %v1502_v4 = vpack.c.bf16 %v2539_v29, %v2539_v29 }
 0x3c9   :  { %v913_v36 = vcombine.high %v889_v60, %v2709_v0  ;;  %v914_v37 = vcombine.high %v896_v3, %v2709_v0  ;;  %v915_v6 = vcombine.high %v905_v31, %v2709_v0  ;;  %v916_v38 = vcombine.high %v912_v34, %v2709_v0  ;;  %1487 = vadd.xlane.f32.xlu1 %v1486_v35 }
 0x3ca   :  { %v2330_v39 = vpack.c.bf16 %v905_v31, %v889_v60  ;;  %v2331_v40 = vpack.c.bf16 %v912_v34, %v896_v3 }
 0x3cb   :  { %v2541_v42 = vpop.eup %2540  ;;  %v2332_v45 = vpack.c.bf16 %v915_v6, %v913_v36  ;;  %v2333_v41 = vpack.c.bf16 %v916_v38, %v914_v37 }
 0x3cc   :  { %v990_v47 = vrot.slane %v2330_v39, %v2853_v23  ;;  %v998_v48 = vrot.slane %v2331_v40, %v2853_v23  ;;  %v1489_v46 = vsel %vm1057_vm2, %v2541_v42, 0.0  ;;  %v1503_v13 = vpack.c.bf16 %v2541_v42, %v2541_v42 }
 0x3cd   :  { %v1015_v49 = vrot.slane %v2332_v45, %v2853_v23  ;;  %v1023_v32 = vrot.slane %v2333_v41, %v2853_v23  ;;  %1490 = vadd.xlane.f32.xlu0 %v1489_v46 }
 0x3ce   :  { %v999_v50 = vcombine.low %v990_v47, %v998_v48 }
 0x3cf   :  { %v1024_v30 = vcombine.low %v1015_v49, %v1023_v32 }
 0x3d0   :  { %v1006_v51 = vrot.slane %v999_v50, %v2859_v27 }
 0x3d1   :  { %v1031_v52 = vrot.slane %v1024_v30, %v2859_v27 }
 0x3d2   :  { %v1007_v53 = vcombine.high %v1006_v51, %v2717_v59  ;;  %v1048_v54 = vshrl.u32 %v1006_v51, 16 }
 0x3d3   :  { %v1047_v55 = vpack.i.b16 %v1031_v52, %v1006_v51  ;;  %v1049_v26 = vshrl.u32 %v1031_v52, 16  ;;  %v1032_v57 = vcombine.high %v1031_v52, %v2717_v59 }
 0x3d4   :  { %v1054_v62 = vshrl.u32 %v1007_v53, 16 }
 0x3d5   :  { %v1695_v5 = vsel %vm1509_vm3, %v1047_v55, 0  ;;  %v1050_v7 = vpack.i.b16 %v1049_v26, %v1048_v54  ;;  %v1053_v9 = vpack.i.b16 %v1032_v57, %v1007_v53  ;;  %v1055_v28 = vshrl.u32 %v1032_v57, 16 }
 0x3d6   :  { %2473 = vmatpush3.bf16.msra.mxu1 %v1695_v5 }
 0x3d7   :  { %v1741_v63 = vsel %vm1509_vm3, %v1050_v7, 0  ;;  %2484 = vmatprep.subr.bf16.mxu1 %v2709_v0  ;;  %v1056_v8 = vpack.i.b16 %v1055_v28, %v1054_v62  ;;  %v1787_v58 = vsel %vm1509_vm3, %v1053_v9, 0 }
 0x3d8   :  { %2479 = vmatpush3.bf16.msra.mxu0 %v1741_v63 }
 0x3d9   :  { %2475 = vmatmul.mubr.msk.bf16.vlgmr.msra.gmra.mrb[24].mxu1 %vm1057_vm2, %v1502_v4  ;;  %2490 = vmatprep.subr.bf16.mxu0 %v2709_v0  ;;  %v1833_v16 = vsel %vm1509_vm3, %v1056_v8, 0 }
 0x3da   :  { %2485 = vmatpush3.bf16.msra.mxu1 %v1787_v58  ;;  %2486 = vmatprep.mubr.msk.bf16.mxu1 %vm2710_vm0, %v2709_v0 }
 0x3db   :  { %2481 = vmatmul.mubr.msk.bf16.vlgmr.msra.gmra.mrb[28].mxu0 %vm1057_vm2, %v1503_v13  ;;  %2496 = vmatprep.subr.bf16.mxu1 %v2709_v0 }
 0x3dc   :  { %2491 = vmatpush3.bf16.msra.mxu0 %v1833_v16  ;;  %2492 = vmatprep.mubr.msk.bf16.mxu0 %vm2710_vm0, %v2709_v0 }
 0x3eb   :  { %v1449_v43 = vpop.xlane.xlu1 %1448 }
 0x3ec   :  { %v1457_v44 = vsub.f32 %v3117_v33, %v1449_v43 }
 0x3ee   :  { %v1472_v56 = vmul.f32 1.442695, %v1457_v44 }
 0x3f0   :  { %2542 = vpow2.f32 %v1472_v56 }
 0x3f1   :  { %v1446_v61 = vpop.xlane.xlu0 %1445 }
 0x3f2   :  { %v1456_v25 = vsub.f32 %v3115_v1, %v1446_v61 }
 0x3f4   :  { %v1470_v19 = vmul.f32 1.442695, %v1456_v25 }
 0x3f6   :  { %2544 = vpow2.f32 %v1470_v19 }
 0x3fa   :  { %v2543_v20 = vpop.eup %2542 }
 0x3fb   :  { %v1495_v11 = vsel %vm1057_vm2, %v2543_v20, 0.0  ;;  %v1505_v12 = vpack.c.bf16 %v2543_v20, %v2543_v20 }
 0x3fc   :  { %1496 = vadd.xlane.f32.xlu0 %v1495_v11 }
 0x3fd   :  { %2493 = vmatmul.mubr.msk.bf16.vlgmr.msra.gmra.mrb[32].mxu0 %vm1057_vm2, %v1505_v12 }
 0x400   :  { %v2545_v14 = vpop.eup %2544 }
 0x401   :  { %v1492_v15 = vsel %vm1057_vm2, %v2545_v14, 0.0  ;;  %v1504_v2 = vpack.c.bf16 %v2545_v14, %v2545_v14 }
 0x402   :  { %1493 = vadd.xlane.f32.xlu1 %v1492_v15 }
 0x403   :  { %2487 = vmatmul.mubr.msk.bf16.vlgmr.msra.gmra.mrb[28].mxu1 %vm1057_vm2, %v1504_v2 }
 0x404   :  { %2500 = vmatprep.mubr.msk.bf16.mxu1 %vm2710_vm0, %v2709_v0 }
 0x446   :  { %v1476_v1 = vpop.xlane.xlu0 %1475 }
 0x447   :  { %2546 = vrcp.f32 %v1476_v1 }
 0x44a   :  { %v1479_v33 = vpop.xlane.xlu0 %1478 }
 0x44b   :  { %2548 = vrcp.f32 %v1479_v33 }
 0x44e   :  { %v1482_v17 = vpop.xlane.xlu1 %1481 }
 0x44f   :  { %2550 = vrcp.f32 %v1482_v17 }
 0x450   :  { %v1485_v18 = vpop.xlane.xlu0 %1484 }
 0x451   :  { %2552 = vrcp.f32 %v1485_v18  ;;  %v2547_v3 = vpop.eup %2546 }
 0x455   :  { %v2549_v36 = vpop.eup %2548 }
 0x459   :  { %v2551_v6 = vpop.eup %2550 }
 0x45b   :  { %v2553_v45 = vpop.eup %2552 }
 0x48d   :  { %v1547_v21 = vpop.f32.mrb[16].mxu1 }
 0x48e   :  { %v2452_v22 = vpop.f32.mrb[17].mxu1  ;;  %v1883_v34 = vmul.f32 %v2547_v3, %v1547_v21 }
 0x48f   :  { %v1550_v24 = vpop.f32.mrb[18].mxu1  ;;  %v1593_v10 = vpop.f32.mrb[20].mxu0 }
 0x490   :  { %v2453_v29 = vpop.f32.mrb[19].mxu1  ;;  %v2458_v60 = vpop.f32.mrb[21].mxu0  ;;  %v1884_v37 = vmul.f32 %v2549_v36, %v1593_v10  ;;  %v1891_v39 = vpack.c.bf16 %v1883_v34, %v1883_v34 }
 0x491   :  { %v1596_v31 = vpop.f32.mrb[22].mxu0 }
 0x492   :  { %v2459_v35 = vpop.f32.mrb[23].mxu0  ;;  %v1925_v48 = vpack.c.bf16 %v1884_v37, %v1884_v37  ;;  %v1898_v51 = vrot.slane %v1891_v39, %v2853_v23 }
 0x494   :  { %v1932_v54 = vrot.slane %v1925_v48, %v2853_v23  ;;  %v1488_v48 = vpop.xlane.xlu1 %1487 }
 0x495   :  { %v1639_v38 = vpop.f32.mrb[20].mxu1 }
 0x496   :  { %v1885_v40 = vmul.f32 %v2551_v6, %v1639_v38  ;;  %v2464_v42 = vpop.f32.mrb[21].mxu1 }
 0x497   :  { %v1642_v41 = vpop.f32.mrb[22].mxu1  ;;  %v1685_v47 = vpop.f32.mrb[24].mxu0 }
 0x498   :  { %v1899_v46 = vpack.c.bf16 %v1885_v40, %v1885_v40  ;;  %v1886_v49 = vmul.f32 %v2553_v45, %v1685_v47  ;;  %v2465_v32 = vpop.f32.mrb[23].mxu1  ;;  %v2470_v50 = vpop.f32.mrb[25].mxu0 }
 0x499   :  { %v1688_v30 = vpop.f32.mrb[26].mxu0  ;;  %v1491_v41 = vpop.xlane.xlu0 %1490 }
 0x49a   :  { %v1906_v52 = vrot.slane %v1899_v46, %v2853_v23  ;;  %v1933_v53 = vpack.c.bf16 %v1886_v49, %v1886_v49  ;;  %v2471_v55 = vpop.f32.mrb[27].mxu0  ;;  %2554 = vrcp.f32 %v1491_v41  ;;  %v1494_v46 = vpop.xlane.xlu1 %1493 }
 0x49c   :  { %v1907_v26 = vcombine.low %v1898_v51, %v1906_v52  ;;  %v1908_v57 = vcombine.high %v1898_v51, %v1906_v52  ;;  %v1940_v62 = vrot.slane %v1933_v53, %v2853_v23 }
 0x49d   :  { %v1497_v47 = vpop.xlane.xlu0 %1496 }
 0x49e   :  { %v1915_v5 = vrot.slane %v1907_v26, %v2859_v27  ;;  %v1922_v7 = vrot.slane %v1908_v57, %v2859_v27  ;;  %v1941_v9 = vcombine.low %v1932_v54, %v1940_v62  ;;  %v1942_v28 = vcombine.high %v1932_v54, %v1940_v62 }
 0x49f   :  { %2556 = vrcp.f32 %v1497_v47 }
 0x4a0   :  { %v1923_v63 = vcombine.high %v1915_v5, %v2717_v59  ;;  %v1949_v4 = vrot.slane %v1941_v9, %v2859_v27  ;;  %v1956_v8 = vrot.slane %v1942_v28, %v2859_v27  ;;  %v1924_v58 = vcombine.high %v1922_v7, %v2717_v59 }
 0x4a1   :  { %v2031_v13 = vshrl.u32 %v1915_v5, 16  ;;  %v2047_v25 = vshrl.u32 %v1922_v7, 16  ;;  %2558 = vrcp.f32 %v1488_v48 }
 0x4a2   :  { %v1957_v16 = vcombine.high %v1949_v4, %v2717_v59  ;;  %v1958_v43 = vcombine.high %v1956_v8, %v2717_v59  ;;  %v2029_v44 = vpack.i.b16 %v1949_v4, %v1915_v5  ;;  %v2032_v56 = vshrl.u32 %v1949_v4, 16 }
 0x4a3   :  { %v2039_v61 = vshrl.u32 %v1923_v63, 16  ;;  %v2045_v19 = vpack.i.b16 %v1956_v8, %v1922_v7  ;;  %v2048_v20 = vshrl.u32 %v1956_v8, 16  ;;  %v2055_v2 = vshrl.u32 %v1924_v58, 16 }
 0x4a4   :  { %v2033_v11 = vpack.i.b16 %v2032_v56, %v2031_v13  ;;  %v2037_v12 = vpack.i.b16 %v1957_v16, %v1923_v63  ;;  %v2040_v14 = vshrl.u32 %v1957_v16, 16  ;;  %v2053_v15 = vpack.i.b16 %v1958_v43, %v1924_v58  ;;  %v2555_v49 = vpop.eup %2554 }
 0x4a5   :  { %v2049_v1 = vpack.i.b16 %v2048_v20, %v2047_v25  ;;  %v2056_v33 = vshrl.u32 %v1958_v43, 16  ;;  %v2091_v17 = vcombine.low %v2029_v44, %v2045_v19  ;;  %2560 = vrcp.f32 %v1494_v46  ;;  %v2528_v46 = vld [vmem:[#allocation8] sm:$0xff]  }
 0x4a6   :  { %v2041_v18 = vpack.i.b16 %v2040_v14, %v2039_v61  ;;  %v2099_v21 = vcombine.low %v2037_v12, %v2053_v15  ;;  %2497 = vmatpush3.bf16.msra.mxu1 %v2528_v46 }
 0x4a7   :  { %v2057_v22 = vpack.i.b16 %v2056_v33, %v2055_v2  ;;  %v2141_v24 = vcombine.low %v2033_v11, %v2049_v1  ;;  %v2098_v10 = vrot.slane %v2091_v17, %v2853_v23  ;;  %2498 = vmatprep.subr.bf16.mxu1 %v2709_v0 }
 0x4a8   :  { %v2106_v29 = vrot.slane %v2099_v21, %v2853_v23 }
 0x4a9   :  { %v2149_v60 = vcombine.low %v2041_v18, %v2057_v22  ;;  %v3214_v35 = vrot.slane %v2141_v24, %v2853_v23  ;;  %v2557_v50 = vpop.eup %2556 }
 0x4aa   :  { %v3211_v31 = vcombine.low %v2098_v10, %v2106_v29 }
 0x4ab   :  { %v3217_v36 = vrot.slane %v2149_v60, %v2853_v23  ;;  %v2559_v51 = vpop.eup %2558 }
 0x4ac   :  { %v1731_v3 = vpop.f32.mrb[24].mxu1 }
 0x4ad   :  { %v2476_v34 = vpop.f32.mrb[25].mxu1  ;;  %v2173_v40 = vcombine.low %v3214_v35, %v3217_v36  ;;  %v1887_v54 = vmul.f32 %v2559_v51, %v1731_v3 }
 0x4ae   :  { %v1734_v37 = vpop.f32.mrb[26].mxu1  ;;  %v1777_v6 = vpop.f32.mrb[28].mxu0 }
 0x4af   :  { %v2477_v38 = vpop.f32.mrb[27].mxu1  ;;  %v2482_v39 = vpop.f32.mrb[29].mxu0  ;;  %v1888_v32 = vmul.f32 %v2555_v49, %v1777_v6  ;;  %v1959_v63 = vpack.c.bf16 %v1887_v54, %v1887_v54 }
 0x4b0   :  { %v1780_v42 = vpop.f32.mrb[30].mxu0  ;;  %v2561_v5 = vpop.eup %2560 }
 0x4b1   :  { %v2483_v45 = vpop.f32.mrb[31].mxu0  ;;  %v1993_v52 = vpack.c.bf16 %v1888_v32, %v1888_v32  ;;  %v1966_v61 = vrot.slane %v1959_v63, %v2853_v23 }
 0x4b3   :  { %v2000_v7 = vrot.slane %v1993_v52, %v2853_v23 }
 0x4d0   :  { %v1869_v30 = vpop.f32.mrb[32].mxu0 }
 0x4d1   :  { %v1890_v53 = vmul.f32 %v2557_v50, %v1869_v30  ;;  %v2494_v55 = vpop.f32.mrb[33].mxu0  ;;  %v2529_v30 = vld [vmem:[#allocation8 + $0x8] sm:$0xff]  }
 0x4d2   :  { %v1872_v26 = vpop.f32.mrb[34].mxu0  ;;  %2499 = vmatpush3.bf16.msra.mxu1 %v2529_v30 }
 0x4d3   :  { %v2001_v57 = vpack.c.bf16 %v1890_v53, %v1890_v53  ;;  %v2495_v62 = vpop.f32.mrb[35].mxu0  ;;  %v2130_v53 = vrot.slane %v3211_v31, %v2859_v27 }
 0x4d4   :  { %v2180_v62 = vrot.slane %v2173_v40, %v2859_v27 }
 0x4d5   :  { %v2008_v9 = vrot.slane %v2001_v57, %v2853_v23 }
 0x4d6   :  { %v1823_v28 = vpop.f32.mrb[28].mxu1 }
 0x4d7   :  { %v1889_v4 = vmul.f32 %v2561_v5, %v1823_v28  ;;  %v2488_v8 = vpop.f32.mrb[29].mxu1  ;;  %v2009_v58 = vcombine.low %v2000_v7, %v2008_v9  ;;  %v2010_v13 = vcombine.high %v2000_v7, %v2008_v9 }
 0x4d8   :  { %v1826_v16 = vpop.f32.mrb[30].mxu1 }
 0x4d9   :  { %v1967_v43 = vpack.c.bf16 %v1889_v4, %v1889_v4  ;;  %v2489_v44 = vpop.f32.mrb[31].mxu1  ;;  %v2017_v56 = vrot.slane %v2009_v58, %v2859_v27  ;;  %v2024_v19 = vrot.slane %v2010_v13, %v2859_v27 }
 0x4db   :  { %v1974_v25 = vrot.slane %v1967_v43, %v2853_v23  ;;  %v2025_v12 = vcombine.high %v2017_v56, %v2717_v59  ;;  %v2026_v2 = vcombine.high %v2024_v19, %v2717_v59  ;;  %v2064_v1 = vshrl.u32 %v2017_v56, 16  ;;  %v2350_v43 = vld [vmem:[#allocation10] ss:$0 sm:$0xff] }
 0x4dc   :  { %v2080_v24 = vshrl.u32 %v2024_v19, 16 }
 0x4dd   :  { %v1975_v20 = vcombine.low %v1966_v61, %v1974_v25  ;;  %v1976_v11 = vcombine.high %v1966_v61, %v1974_v25  ;;  %v2072_v22 = vshrl.u32 %v2025_v12, 16  ;;  %v2088_v6 = vshrl.u32 %v2026_v2, 16 }
 0x4df   :  { %v1983_v14 = vrot.slane %v1975_v20, %v2859_v27  ;;  %v1990_v15 = vrot.slane %v1976_v11, %v2859_v27 }
 0x4e1   :  { %v1991_v33 = vcombine.high %v1983_v14, %v2717_v59  ;;  %v1992_v17 = vcombine.high %v1990_v15, %v2717_v59  ;;  %v2061_v18 = vpack.i.b16 %v2017_v56, %v1983_v14  ;;  %v2063_v21 = vshrl.u32 %v1983_v14, 16 }
 0x4e2   :  { %v2077_v10 = vpack.i.b16 %v2024_v19, %v1990_v15  ;;  %v2079_v29 = vshrl.u32 %v1990_v15, 16 }
 0x4e3   :  { %v2065_v60 = vpack.i.b16 %v2064_v1, %v2063_v21  ;;  %v2069_v3 = vpack.i.b16 %v2025_v12, %v1991_v33  ;;  %v2071_v34 = vshrl.u32 %v1991_v33, 16  ;;  %v2085_v37 = vpack.i.b16 %v2026_v2, %v1992_v17 }
 0x4e4   :  { %v2081_v38 = vpack.i.b16 %v2080_v24, %v2079_v29  ;;  %v2087_v39 = vshrl.u32 %v1992_v17, 16  ;;  %v2107_v42 = vcombine.low %v2061_v18, %v2077_v10 }
 0x4e5   :  { %v2073_v45 = vpack.i.b16 %v2072_v22, %v2071_v34  ;;  %v2115_v41 = vcombine.low %v2069_v3, %v2085_v37 }
 0x4e6   :  { %v2089_v47 = vpack.i.b16 %v2088_v6, %v2087_v39  ;;  %v2157_v48 = vcombine.low %v2065_v60, %v2081_v38  ;;  %v2114_v59 = vrot.slane %v2107_v42, %v2853_v23 }
 0x4e7   :  { %v2122_v49 = vrot.slane %v2115_v41, %v2853_v23 }
 0x4e8   :  { %v2165_v32 = vcombine.low %v2073_v45, %v2089_v47  ;;  %v2164_v51 = vrot.slane %v2157_v48, %v2853_v23 }
 0x4e9   :  { %v2131_v50 = vcombine.low %v2114_v59, %v2122_v49 }
 0x4ea   :  { %v2172_v52 = vrot.slane %v2165_v32, %v2853_v23 }
 0x4eb   :  { %v2138_v55 = vrot.slane %v2131_v50, %v2859_v27 }
 0x4ec   :  { %v2181_v54 = vcombine.low %v2164_v51, %v2172_v52 }
 0x4ed   :  { %v2140_v26 = vcombine.high %v2130_v53, %v2138_v55  ;;  %v2139_v57 = vcombine.low %v2130_v53, %v2138_v55 }
 0x4ee   :  { %v2188_v0 = vrot.slane %v2181_v54, %v2859_v27 }
 0x4ef   :  { %v2194_v9 = vshrl.u32 %v2139_v57, 16  ;;  %v2200_v23 = vshrl.u32 %v2140_v26, 16 }
 0x4f0   :  { %v2190_v5 = vcombine.high %v2180_v62, %v2188_v0  ;;  %v2189_v7 = vcombine.low %v2180_v62, %v2188_v0 }
 0x4f2   :  { %v2199_v28 = vpack.i.b16 %v2190_v5, %v2140_v26  ;;  %v2195_v63 = vshrl.u32 %v2189_v7, 16  ;;  %v2201_v31 = vshrl.u32 %v2190_v5, 16  ;;  %v2193_v4 = vpack.i.b16 %v2189_v7, %v2139_v57 }
 0x4f4   :  { %2205 = vrot.lane.b32.xlu0 %v2199_v28, %s2718_s30  ;;  %v2196_v8 = vpack.i.b16 %v2195_v63, %v2194_v9  ;;  %v2202_v58 = vpack.i.b16 %v2201_v31, %v2200_v23 }
 0x4f6   :  { %2203 = vrot.lane.b32.xlu1 %v2196_v8, %s2719_s7 }
 0x4fa   :  { %2207 = vrot.lane.b32.xlu1 %v2202_v58, %s2720_s8 }
 0x566   :  { %v2206_v36 = vpop.permute.xlu0 %2205 }
 0x568   :  { %v2204_v35 = vpop.permute.xlu1 %2203 }
 0x569   :  { %v2211_v27 = vsel %vm1057_vm2, %v2193_v4, %v2204_v35 }
 0x56a   :  { %v2214_v13 = vsel %vm2212_vm4, %v2211_v27, %v2206_v36 }
 0x56c   :  { %v2208_v40 = vpop.permute.xlu1 %2207 }
 0x56d   :  { %v2217_v16 = vsel %vm2215_vm5, %v2214_v13, %v2208_v40 }
 0x56e   :  { %2501 = vmatmul.mubr.msk.bf16.vlgmr.msra.gmra.mrb[32].mxu1 %vm116_vm1, %v2217_v16 }
 0x641   :  { %v2277_v44 = vpop.f32.mrb[32].mxu1 }
 0x642   :  { %v2278_v56 = vadd.f32 %v2350_v43, %v2277_v44  ;;  %v2502_v61 = vpop.f32.mrb[33].mxu1 }
 0x643   :  { %v2280_v25 = vpop.f32.mrb[34].mxu1 }
 0x644   :  { %2284 = vst.msk [vmem:[#allocation11] sm:$0xff] %vm116_vm1, %v2278_v56  ;;  %v2281_v19 = vadd.f32 %v2350_v43, %v2280_v25  ;;  %v2503_v20 = vpop.f32.mrb[35].mxu1 }
 0x646   :  { %2285 = vst.msk [vmem:[#allocation11 + $0x8] sm:$0xff] %vm116_vm1, %v2281_v19 }
 0x647   :  { %2683 = shalt.err (!%p2680_p2)
}
 0x648   :  { %s2684_s14 = scalar_lea.hbm %s3269_s5, 256 }
 0x649   :  { %p2685_p3 = scmp.ne.s32.totalorder %s3269_s5, %s2684_s14  ;;  %p2688_p4 = scmp.lt.u32.totalorder %s2684_s14, %s3269_s5 }
 0x64b   :  { %p2690_p5 = pnand %p2688_p4, %p2685_p3 }
 0x64d   :  { %2693 = shalt.err (!%p2690_p5)
}
 0x64e   :  { %s2722_s1 = smov 128  }
 0x64f   :  { %2297 = dma.vmem_to_hbm [thread:$0]  %s2292_s10, 256, %s3269_s5, [#allocation4], %s2722_s1, %s2722_s1, %s2719_s7  }
 0x650   :  { %2700 = dma.done.wait [#allocation4], 256  }
 0x651   :  { %2701 = vsyncadd [#allocation4], 4294967040 }
 0x652   :  { %2301 = vsyncpa [#allocation3], 1 }
 0x653   :  { %2302 = vsyncpa [#allocation6], 1 }
 0x654   :  { %2303 = vsyncpa [#allocation9], 1 }
 0x655   :  { %2304 = vsyncpa [#allocation4], 1 }

// kernel: tpu_custom_call.1
= control target key start
LH: loop header
LB: loop body
LE: loop exit
PB: predicated region body
PF: predicated region fallthrough
CT: control target
= control target key end

     0   :  { %10 = vsyncpa [#allocation3], 0  ;;  %s3264_s0 = inlined_call_operand.hbm [shape: bf16[2,8,32], index: 0, kind: input, shape index: {}]   ;;  %s3265_s1 = inlined_call_operand.hbm [shape: bf16[32,96], index: 1, kind: input, shape index: {}]   ;;  %s3266_s2 = inlined_call_operand.hbm [shape: f32[1,96], index: 2, kind: input, shape index: {}]   ;;  %s3267_s3 = inlined_call_operand.hbm [shape: bf16[32,32], index: 3, kind: input, shape index: {}]   ;;  %s3268_s4 = inlined_call_operand.hbm [shape: f32[1,32], index: 4, kind: input, shape index: {}]   ;;  %s3269_s5 = inlined_call_operand.hbm [shape: f32[2,8,32], index: 5, kind: output, shape index: {}]  }
   0x1   :  { %11 = vsyncpa [#allocation6], 0 }
   0x2   :  { %12 = vsyncpa [#allocation9], 0 }
   0x3   :  { %13 = vsyncpa [#allocation4], 0  ;;  %s2702_s18 = smov [#allocation5]   ;;  %s2703_s20 = smov [#allocation8]  }
   0x4   :  { %s31_s19 = sshll.u32 %s2702_s18, 4  ;;  %s53_s21 = sshll.u32 %s2703_s20, 4  ;;  %s32_s19 = int_to_ptr.vmem [resolvable:$true] %s31_s19  ;;  %s2753_s21 = int_to_ptr.vmem [resolvable:$true] %s53_s21 }
   0x5   :  { %s2562_s24 = scalar_lea.hbm %s3265_s1, 256 }
   0x6   :  { %p2563_p0 = scmp.ne.s32.totalorder %s3265_s1, %s2562_s24  ;;  %p2566_p1 = scmp.lt.u32.totalorder %s2562_s24, %s3265_s1 }
   0x8   :  { %p2568_p2 = pnand %p2566_p1, %p2563_p0 }
   0xa   :  { %2571 = shalt.err (!%p2568_p2)
}
   0xb   :  { %s2572_s29 = scalar_lea.vmem %s32_s19, 256  ;;  %p2577_p4 = scmp.lt.s32.totalorder %s32_s19, %s32_s19 }
   0xc   :  { %p2573_p3 = scmp.ne.s32.totalorder %s32_s19, %s2572_s29  ;;  %p2578_p5 = scmp.lt.s32.totalorder %s2572_s29, %s2572_s29 }
   0xe   :  { %p2579_p6 = por %p2578_p5, %p2577_p4 }
  0x10   :  { %p2580_p7 = pnand %p2579_p6, %p2573_p3 }
  0x12   :  { %2583 = shalt.err (!%p2580_p7)
}
  0x13   :  { %s2704_s30 = smov 64   ;;  %s2705_s6 = smov 4  }
  0x14   :  { %37 = dma.hbm_to_vmem [thread:$0]  %s3265_s1, 256, %s32_s19, [#allocation6], %s2704_s30, %s2704_s30, %s2705_s6  }
  0x15   :  { %s2584_s11 = scalar_lea.hbm %s3267_s3, 256 }
  0x16   :  { %p2585_p8 = scmp.ne.s32.totalorder %s3267_s3, %s2584_s11  ;;  %p2588_p9 = scmp.lt.u32.totalorder %s2584_s11, %s3267_s3 }
  0x18   :  { %p2590_p10 = pnand %p2588_p9, %p2585_p8 }
  0x1a   :  { %2593 = shalt.err (!%p2590_p10)
}
  0x1b   :  { %s2594_s16 = scalar_lea.vmem %s2753_s21, 256  ;;  %p2599_p12 = scmp.lt.s32.totalorder %s2753_s21, %s2753_s21 }
  0x1c   :  { %p2595_p11 = scmp.ne.s32.totalorder %s2753_s21, %s2594_s16  ;;  %p2600_p13 = scmp.lt.s32.totalorder %s2594_s16, %s2594_s16 }
  0x1e   :  { %p2601_p0 = por %p2600_p13, %p2599_p12 }
  0x20   :  { %p2602_p1 = pnand %p2601_p0, %p2595_p11 }
  0x22   :  { %2605 = shalt.err (!%p2602_p1)
}
  0x23   :  { %59 = dma.hbm_to_vmem [thread:$0]  %s3267_s3, 256, %s2753_s21, [#allocation9], %s2704_s30, %s2704_s30, %s2705_s6  }
  0x24   :  { %s2706_s18 = smov [#allocation2]   ;;  %s2707_s20 = smov [#allocation7]  }
  0x25   :  { %s19_s19 = sshll.u32 %s2706_s18, 4  ;;  %s44_s22 = sshll.u32 %s2707_s20, 4  ;;  %s20_s19 = int_to_ptr.vmem [resolvable:$true] %s19_s19  ;;  %s45_s22 = int_to_ptr.vmem [resolvable:$true] %s44_s22 }
  0x26   :  { %s2606_s25 = scalar_lea.hbm %s3264_s0, 128 }
  0x27   :  { %p2607_p2 = scmp.ne.s32.totalorder %s3264_s0, %s2606_s25  ;;  %p2610_p3 = scmp.lt.u32.totalorder %s2606_s25, %s3264_s0 }
  0x29   :  { %p2612_p4 = pnand %p2610_p3, %p2607_p2 }
  0x2b   :  { %2615 = shalt.err (!%p2612_p4)
}
  0x2c   :  { %s2616_s3 = scalar_lea.vmem %s20_s19, 128  ;;  %p2621_p6 = scmp.lt.s32.totalorder %s20_s19, %s20_s19 }
  0x2d   :  { %p2617_p5 = scmp.ne.s32.totalorder %s20_s19, %s2616_s3  ;;  %p2622_p7 = scmp.lt.s32.totalorder %s2616_s3, %s2616_s3 }
  0x2f   :  { %p2623_p8 = por %p2622_p7, %p2621_p6 }
  0x31   :  { %p2624_p9 = pnand %p2623_p8, %p2617_p5 }
  0x33   :  { %2627 = shalt.err (!%p2624_p9)
}
  0x34   :  { %25 = dma.hbm_to_vmem [thread:$0]  %s3264_s0, 128, %s20_s19, [#allocation3], %s2704_s30, %s2704_s30, %s2705_s6  }
  0x35   :  { %s2628_s10 = scalar_lea.hbm %s3266_s2, 16 }
  0x36   :  { %p2629_p10 = scmp.ne.s32.totalorder %s3266_s2, %s2628_s10  ;;  %p2632_p11 = scmp.lt.u32.totalorder %s2628_s10, %s3266_s2 }
  0x38   :  { %p2634_p12 = pnand %p2632_p11, %p2629_p10 }
  0x3a   :  { %2637 = shalt.err (!%p2634_p12)
}
  0x3b   :  { %s2638_s15 = scalar_lea.vmem %s45_s22, 16  ;;  %s2642_s16 = scalar_lea.vmem %s45_s22, 32 }
  0x3c   :  { %p2639_p13 = scmp.ne.s32.totalorder %s45_s22, %s2638_s15  ;;  %p2643_p0 = scmp.lt.s32.totalorder %s45_s22, %s45_s22 }
  0x3d   :  { %p2644_p1 = scmp.lt.s32.totalorder %s2642_s16, %s2638_s15 }
  0x3f   :  { %p2645_p2 = por %p2644_p1, %p2643_p0 }
  0x41   :  { %p2646_p3 = pnand %p2645_p2, %p2639_p13 }
  0x43   :  { %2649 = shalt.err (!%p2646_p3)
}
  0x44   :  { %47 = dma.hbm_to_vmem [thread:$0]  %s3266_s2, 16, %s45_s22, [#allocation6]  }
  0x45   :  { %s2708_s1 = smov [#allocation10]   ;;  %s2650_s20 = scalar_lea.hbm %s3268_s4, 16 }
  0x46   :  { %s66_s17 = sshll.u32 %s2708_s1, 4  ;;  %p2651_p4 = scmp.ne.s32.totalorder %s3268_s4, %s2650_s20  ;;  %s67_s17 = int_to_ptr.vmem [resolvable:$true] %s66_s17 }
  0x47   :  { %p2654_p5 = scmp.lt.u32.totalorder %s2650_s20, %s3268_s4 }
  0x49   :  { %p2656_p6 = pnand %p2654_p5, %p2651_p4 }
  0x4b   :  { %2659 = shalt.err (!%p2656_p6)
}
  0x4c   :  { %s2660_s27 = scalar_lea.vmem %s67_s17, 16  ;;  %s2664_s2 = scalar_lea.vmem %s67_s17, 32 }
  0x4d   :  { %p2661_p7 = scmp.ne.s32.totalorder %s67_s17, %s2660_s27  ;;  %p2665_p8 = scmp.lt.s32.totalorder %s67_s17, %s67_s17 }
  0x4e   :  { %p2666_p9 = scmp.lt.s32.totalorder %s2664_s2, %s2660_s27 }
  0x50   :  { %p2667_p10 = por %p2666_p9, %p2665_p8 }
  0x52   :  { %p2668_p11 = pnand %p2667_p10, %p2661_p7 }
  0x54   :  { %2671 = shalt.err (!%p2668_p11)
}
  0x55   :  { %69 = dma.hbm_to_vmem [thread:$0]  %s3268_s4, 16, %s67_s17, [#allocation9]  }
  0x56   :  { %2694 = dma.done.wait [#allocation3], 128  }
  0x57   :  { %2695 = vsyncadd [#allocation3], 4294967168 }
  0x58   :  { %2696 = dma.done.wait [#allocation6], 272  }
  0x59   :  { %2697 = vsyncadd [#allocation6], 4294967024 }
  0x5a   :  { %2698 = dma.done.wait [#allocation9], 272  }
  0x5b   :  { %2699 = vsyncadd [#allocation9], 4294967024  ;;  %v2709_v0 = vmov 0.0   ;;  %vm2710_vm0 = vmmov 0   ;;  %v2525_v1 = vld [vmem:[#allocation5] sm:$0xff]   ;;  %v2526_v2 = vld [vmem:[#allocation5 + $0x8] sm:$0xff]   ;;  %v186_v13 = vlaneseq }
  0x5c   :  { %2392 = vmatprep.subr.bf16.mxu0 %v2709_v0  ;;  %2396 = vmatprep.mubr.msk.bf16.mxu0 %vm2710_vm0, %v2709_v0  ;;  %v2527_v3 = vld [vmem:[#allocation2] sm:$0xff]   ;;  %vm116_vm1 = vcmask 261120   ;;  %v2305_v4 = vld [vmem:[#allocation7] ss:$0 sm:$0xff]  ;;  %s2711_s4 = smov 104   ;;  %s2712_s29 = smov 120  }
  0x5d   :  { %2400 = vmatprep.subr.bf16.mxu1 %v2709_v0  ;;  %2402 = vmatprep.mubr.msk.bf16.mxu1 %vm2710_vm0, %v2709_v0  ;;  %s2713_s3 = smov 112   ;;  %s2714_s21 = smov 96   ;;  %v2715_v11 = vmov 1983009808   ;;  %v2716_v14 = vmov 1934713408  }
  0x5e   :  { %2393 = vmatpush3.bf16.msra.mxu0 %v2525_v1  ;;  %v184_v12 = vunpack.c.l.s4 %v2715_v11  ;;  %v216_v15 = vunpack.c.l.s4 %v2716_v14  ;;  %v187_v17 = vshrl.u32 %v186_v13, 7  ;;  %v2717_v59 = vmov 0   ;;  %s2719_s7 = smov 8   ;;  %s2720_s8 = smov 24  }
  0x5f   :  { %2394 = vmatprep.subr.bf16.mxu0 %v2709_v0  ;;  %vm1057_vm2 = vcmask 64512   ;;  %vm1509_vm3 = vcmask 1043456   ;;  %vm2212_vm4 = vcmask 130048   ;;  %vm2215_vm5 = vcmask 195584   ;;  %s2721_s9 = smov [#allocation11]  }
  0x60   :  { %v185_v16 = vunpack.c.0.s8 %v184_v12  ;;  %v217_v22 = vunpack.c.0.s8 %v216_v15  ;;  %s2291_s10 = sshll.u32 %s2721_s9, 4  ;;  %s2292_s10 = int_to_ptr.vmem [resolvable:$true] %s2291_s10 }
  0x61   :  { %s2672_s11 = scalar_lea.vmem %s2292_s10, 256  ;;  %p2677_p13 = scmp.lt.s32.totalorder %s2292_s10, %s2292_s10 }
  0x62   :  { %2395 = vmatpush3.bf16.msra.mxu0 %v2526_v2  ;;  %v2853_v23 = vsub.s32 %v185_v16, %v187_v17  ;;  %v2859_v27 = vsub.s32 %v217_v22, %v187_v17  ;;  %p2673_p12 = scmp.ne.s32.totalorder %s2292_s10, %s2672_s11  ;;  %p2678_p0 = scmp.lt.s32.totalorder %s2672_s11, %s2672_s11 }
  0x63   :  { %2406 = vmatprep.subr.bf16.mxu0 %v2709_v0 }
  0x64   :  { %p2679_p1 = por %p2678_p0, %p2677_p13 }
  0x65   :  { %2397 = vmatmul.mubr.msk.bf16.vlgmr.msra.gmra.mrb[0].mxu0 %vm116_vm1, %v2527_v3 }
  0x66   :  { %2408 = vmatprep.mubr.msk.bf16.mxu0 %vm2710_vm0, %v2709_v0  ;;  %p2680_p2 = pnand %p2679_p1, %p2673_p12 }
 0x138   :  { %v154_v5 = vpop.f32.mrb[0].mxu0 }
 0x139   :  { %v2840_v6 = vadd.f32 %v2305_v4, %v154_v5  ;;  %v2398_v7 = vpop.f32.mrb[1].mxu0 }
 0x13a   :  { %v157_v8 = vpop.f32.mrb[2].mxu0 }
 0x13b   :  { %175 = vrot.lane.b32.xlu1 %v2840_v6, %s2711_s4  ;;  %163 = vrot.lane.b32.xlu0 %v2840_v6, %s2712_s29  ;;  %v2399_v9 = vpop.f32.mrb[3].mxu0  ;;  %v2844_v10 = vadd.f32 %v2305_v4, %v157_v8 }
 0x13f   :  { %169 = vrot.lane.b32.xlu0 %v2840_v6, %s2713_s3  ;;  %165 = vrot.lane.b32.xlu1 %v2844_v10, %s2712_s29 }
 0x143   :  { %171 = vrot.lane.b32.xlu0 %v2844_v10, %s2713_s3  ;;  %177 = vrot.lane.b32.xlu1 %v2844_v10, %s2711_s4 }
 0x147   :  { %457 = vrot.lane.b32.xlu0 %v2840_v6, %s2714_s21 }
 0x1ad   :  { %v176_v18 = vpop.permute.xlu1 %175  ;;  %v164_v19 = vpop.permute.xlu0 %163 }
 0x1ae   :  { %v197_v20 = vcombine.low %v164_v19, %v176_v18  ;;  %v198_v21 = vcombine.high %v164_v19, %v176_v18  ;;  %461 = vrot.lane.b32.xlu1 %v164_v19, %s2714_s21 }
 0x1b0   :  { %v205_v28 = vrot.slane %v197_v20, %v2853_v23  ;;  %v212_v29 = vrot.slane %v198_v21, %v2853_v23 }
 0x1b1   :  { %v170_v24 = vpop.permute.xlu0 %169  ;;  %v2865_v32 = vpop.permute.xlu1 %165 }
 0x1b2   :  { %v181_v25 = vcombine.low %v2840_v6, %v170_v24  ;;  %v182_v26 = vcombine.high %v2840_v6, %v170_v24  ;;  %465 = vrot.lane.b32.xlu0 %v170_v24, %s2714_s21  ;;  %469 = vrot.lane.b32.xlu1 %v176_v18, %s2714_s21 }
 0x1b4   :  { %v189_v30 = vrot.slane %v181_v25, %v2853_v23  ;;  %v196_v31 = vrot.slane %v182_v26, %v2853_v23 }
 0x1b5   :  { %v2875_v41 = vpop.permute.xlu0 %171  ;;  %v2881_v46 = vpop.permute.xlu1 %177 }
 0x1b6   :  { %v213_v33 = vcombine.low %v189_v30, %v205_v28  ;;  %v214_v34 = vcombine.high %v189_v30, %v205_v28  ;;  %v229_v35 = vcombine.low %v196_v31, %v212_v29  ;;  %v230_v36 = vcombine.high %v196_v31, %v212_v29  ;;  %459 = vrot.lane.b32.xlu0 %v2844_v10, %s2714_s21 }
 0x1b7   :  { %463 = vrot.lane.b32.xlu1 %v2865_v32, %s2714_s21  ;;  %v249_v7 = vcombine.low %v2844_v10, %v2875_v41  ;;  %v265_v8 = vcombine.low %v2865_v32, %v2881_v46  ;;  %v250_v12 = vcombine.high %v2844_v10, %v2875_v41  ;;  %v266_v14 = vcombine.high %v2865_v32, %v2881_v46 }
 0x1b8   :  { %v221_v37 = vrot.slane %v213_v33, %v2859_v27  ;;  %v228_v38 = vrot.slane %v214_v34, %v2859_v27  ;;  %v237_v39 = vrot.slane %v229_v35, %v2859_v27  ;;  %v244_v40 = vrot.slane %v230_v36, %v2859_v27 }
 0x1b9   :  { %v458_v9 = vpop.permute.xlu0 %457  ;;  %v257_v13 = vrot.slane %v249_v7, %v2853_v23  ;;  %v273_v15 = vrot.slane %v265_v8, %v2853_v23  ;;  %v264_v26 = vrot.slane %v250_v12, %v2853_v23  ;;  %v280_v28 = vrot.slane %v266_v14, %v2853_v23 }
 0x1ba   :  { %v245_v42 = vcombine.high %v221_v37, %v2709_v0  ;;  %v246_v43 = vcombine.high %v228_v38, %v2709_v0  ;;  %v247_v44 = vcombine.high %v237_v39, %v2709_v0  ;;  %v248_v45 = vcombine.high %v244_v40, %v2709_v0  ;;  %467 = vrot.lane.b32.xlu0 %v2875_v41, %s2714_s21 }
 0x1bb   :  { %v2310_v47 = vpack.c.bf16 %v237_v39, %v221_v37  ;;  %v2311_v48 = vpack.c.bf16 %v244_v40, %v228_v38  ;;  %471 = vrot.lane.b32.xlu1 %v2881_v46, %s2714_s21  ;;  %v281_v29 = vcombine.low %v257_v13, %v273_v15  ;;  %v282_v30 = vcombine.high %v257_v13, %v273_v15 }
 0x1bc   :  { %v2312_v49 = vpack.c.bf16 %v247_v44, %v245_v42  ;;  %v2313_v50 = vpack.c.bf16 %v248_v45, %v246_v43  ;;  %v297_v45 = vcombine.low %v264_v26, %v280_v28 }
 0x1bd   :  { %v340_v51 = vrot.slane %v2310_v47, %v2853_v23  ;;  %v348_v52 = vrot.slane %v2311_v48, %v2853_v23  ;;  %v2945_v43 = vrot.slane %v281_v29, %v2859_v27  ;;  %v2948_v44 = vrot.slane %v282_v30, %v2859_v27 }
 0x1be   :  { %757 = vrot.lane.b32.xlu0 %v2840_v6, %s2704_s30  ;;  %v365_v53 = vrot.slane %v2312_v49, %v2853_v23  ;;  %v373_v55 = vrot.slane %v2313_v50, %v2853_v23  ;;  %v298_v47 = vcombine.high %v264_v26, %v280_v28 }
 0x1bf   :  { %761 = vrot.lane.b32.xlu1 %v164_v19, %s2704_s30  ;;  %v349_v54 = vcombine.low %v340_v51, %v348_v52  ;;  %v2970_v26 = vcombine.high %v2945_v43, %v2709_v0  ;;  %v2974_v28 = vcombine.high %v2948_v44, %v2709_v0 }
 0x1c0   :  { %v374_v57 = vcombine.low %v365_v53, %v373_v55 }
 0x1c1   :  { %v2895_v56 = vrot.slane %v349_v54, %v2859_v27 }
 0x1c2   :  { %765 = vrot.lane.b32.xlu0 %v170_v24, %s2704_s30  ;;  %v2900_v58 = vrot.slane %v374_v57, %v2859_v27 }
 0x1c3   :  { %769 = vrot.lane.b32.xlu1 %v176_v18, %s2704_s30  ;;  %v2904_v60 = vcombine.high %v2895_v56, %v2717_v59  ;;  %v436_v62 = vshrl.u32 %v2895_v56, 16 }
 0x1c4   :  { %v435_v61 = vpack.i.b16 %v2900_v58, %v2895_v56  ;;  %v437_v63 = vshrl.u32 %v2900_v58, 16  ;;  %v2912_v1 = vcombine.high %v2900_v58, %v2717_v59 }
 0x1c5   :  { %v442_v4 = vshrl.u32 %v2904_v60, 16 }
 0x1c6   :  { %v2916_v2 = vpack.i.b16 %v437_v63, %v436_v62  ;;  %v441_v3 = vpack.i.b16 %v2912_v1, %v2904_v60  ;;  %v443_v5 = vshrl.u32 %v2912_v1, 16 }
 0x1c7   :  { %759 = vrot.lane.b32.xlu1 %v2844_v10, %s2704_s30 }
 0x1c8   :  { %v2922_v6 = vpack.i.b16 %v443_v5, %v442_v4 }
 0x220   :  { %v462_v11 = vpop.permute.xlu1 %461 }
 0x224   :  { %v466_v16 = vpop.permute.xlu0 %465  ;;  %v470_v17 = vpop.permute.xlu1 %469 }
 0x225   :  { %v481_v18 = vcombine.low %v458_v9, %v466_v16  ;;  %v482_v19 = vcombine.high %v458_v9, %v466_v16  ;;  %v497_v20 = vcombine.low %v462_v11, %v470_v17  ;;  %v498_v21 = vcombine.high %v462_v11, %v470_v17 }
 0x227   :  { %v489_v22 = vrot.slane %v481_v18, %v2853_v23  ;;  %v496_v24 = vrot.slane %v482_v19, %v2853_v23  ;;  %v505_v25 = vrot.slane %v497_v20, %v2853_v23  ;;  %v512_v10 = vrot.slane %v498_v21, %v2853_v23 }
 0x228   :  { %v460_v31 = vpop.permute.xlu0 %459  ;;  %v2963_v19 = vrot.slane %v297_v45, %v2859_v27  ;;  %v2966_v20 = vrot.slane %v298_v47, %v2859_v27 }
 0x229   :  { %v513_v33 = vcombine.low %v489_v22, %v505_v25  ;;  %v514_v34 = vcombine.high %v489_v22, %v505_v25  ;;  %v529_v35 = vcombine.low %v496_v24, %v512_v10  ;;  %v530_v36 = vcombine.high %v496_v24, %v512_v10  ;;  %v464_v37 = vpop.permute.xlu1 %463 }
 0x22b   :  { %v521_v38 = vrot.slane %v513_v33, %v2859_v27  ;;  %v528_v39 = vrot.slane %v514_v34, %v2859_v27  ;;  %v537_v40 = vrot.slane %v529_v35, %v2859_v27  ;;  %v544_v42 = vrot.slane %v530_v36, %v2859_v27 }
 0x22c   :  { %v468_v48 = vpop.permute.xlu0 %467 }
 0x22d   :  { %v545_v49 = vcombine.high %v521_v38, %v2709_v0  ;;  %v546_v50 = vcombine.high %v528_v39, %v2709_v0  ;;  %v547_v51 = vcombine.high %v537_v40, %v2709_v0  ;;  %v548_v52 = vcombine.high %v544_v42, %v2709_v0  ;;  %v472_v53 = vpop.permute.xlu1 %471 }
 0x22e   :  { %v2318_v54 = vpack.c.bf16 %v537_v40, %v521_v38  ;;  %v2319_v55 = vpack.c.bf16 %v544_v42, %v528_v39  ;;  %v549_v57 = vcombine.low %v460_v31, %v468_v48  ;;  %v550_v62 = vcombine.high %v460_v31, %v468_v48 }
 0x22f   :  { %v2320_v63 = vpack.c.bf16 %v547_v51, %v545_v49  ;;  %v2321_v4 = vpack.c.bf16 %v548_v52, %v546_v50  ;;  %v565_v5 = vcombine.low %v464_v37, %v472_v53  ;;  %v566_v7 = vcombine.high %v464_v37, %v472_v53 }
 0x230   :  { %v557_v8 = vrot.slane %v549_v57, %v2853_v23  ;;  %v564_v9 = vrot.slane %v550_v62, %v2853_v23  ;;  %v758_v11 = vpop.permute.xlu0 %757  ;;  %v640_v12 = vrot.slane %v2318_v54, %v2853_v23  ;;  %v648_v13 = vrot.slane %v2319_v55, %v2853_v23 }
 0x231   :  { %v573_v14 = vrot.slane %v565_v5, %v2853_v23  ;;  %v580_v15 = vrot.slane %v566_v7, %v2853_v23  ;;  %v762_v16 = vpop.permute.xlu1 %761  ;;  %v665_v17 = vrot.slane %v2320_v63, %v2853_v23  ;;  %v673_v18 = vrot.slane %v2321_v4, %v2853_v23 }
 0x232   :  { %v649_v21 = vcombine.low %v640_v12, %v648_v13  ;;  %v315_v54 = vcombine.high %v2963_v19, %v2709_v0  ;;  %v316_v63 = vcombine.high %v2966_v20, %v2709_v0 }
 0x233   :  { %v581_v22 = vcombine.low %v557_v8, %v573_v14  ;;  %v582_v24 = vcombine.high %v557_v8, %v573_v14  ;;  %v597_v25 = vcombine.low %v564_v9, %v580_v15  ;;  %v598_v10 = vcombine.high %v564_v9, %v580_v15 }
 0x234   :  { %v766_v29 = vpop.permute.xlu0 %765  ;;  %v656_v30 = vrot.slane %v649_v21, %v2859_v27  ;;  %v674_v31 = vcombine.low %v665_v17, %v673_v18 }
 0x235   :  { %v589_v33 = vrot.slane %v581_v22, %v2859_v27  ;;  %v596_v34 = vrot.slane %v582_v24, %v2859_v27  ;;  %v605_v35 = vrot.slane %v597_v25, %v2859_v27  ;;  %v612_v36 = vrot.slane %v598_v10, %v2859_v27  ;;  %v770_v37 = vpop.permute.xlu1 %769 }
 0x236   :  { %v781_v38 = vcombine.low %v758_v11, %v766_v29  ;;  %v782_v39 = vcombine.high %v758_v11, %v766_v29  ;;  %v797_v40 = vcombine.low %v762_v16, %v770_v37  ;;  %v798_v42 = vcombine.high %v762_v16, %v770_v37 }
 0x237   :  { %v613_v45 = vcombine.high %v589_v33, %v2709_v0  ;;  %v614_v47 = vcombine.high %v596_v34, %v2709_v0  ;;  %v615_v48 = vcombine.high %v605_v35, %v2709_v0  ;;  %v616_v49 = vcombine.high %v612_v36, %v2709_v0 }
 0x238   :  { %v2322_v50 = vpack.c.bf16 %v605_v35, %v589_v33  ;;  %v2323_v51 = vpack.c.bf16 %v612_v36, %v596_v34  ;;  %v789_v52 = vrot.slane %v781_v38, %v2853_v23  ;;  %v796_v53 = vrot.slane %v782_v39, %v2853_v23 }
 0x239   :  { %v2324_v55 = vpack.c.bf16 %v615_v48, %v613_v45  ;;  %v805_v57 = vrot.slane %v797_v40, %v2853_v23  ;;  %v812_v62 = vrot.slane %v798_v42, %v2853_v23  ;;  %v2325_v5 = vpack.c.bf16 %v616_v49, %v614_v47 }
 0x23a   :  { %v690_v4 = vrot.slane %v2322_v50, %v2853_v23  ;;  %v681_v7 = vrot.slane %v674_v31, %v2859_v27  ;;  %v698_v8 = vrot.slane %v2323_v51, %v2853_v23  ;;  %v736_v12 = vshrl.u32 %v656_v30, 16 }
 0x23b   :  { %v813_v9 = vcombine.low %v789_v52, %v805_v57  ;;  %v814_v11 = vcombine.high %v789_v52, %v805_v57  ;;  %v829_v13 = vcombine.low %v796_v53, %v812_v62  ;;  %v830_v14 = vcombine.high %v796_v53, %v812_v62 }
 0x23c   :  { %v735_v15 = vpack.i.b16 %v681_v7, %v656_v30  ;;  %v737_v16 = vshrl.u32 %v681_v7, 16  ;;  %v715_v17 = vrot.slane %v2324_v55, %v2853_v23  ;;  %v682_v22 = vcombine.high %v681_v7, %v2717_v59 }
 0x23d   :  { %v821_v18 = vrot.slane %v813_v9, %v2859_v27  ;;  %v828_v21 = vrot.slane %v814_v11, %v2859_v27  ;;  %v837_v24 = vrot.slane %v829_v13, %v2859_v27  ;;  %v844_v25 = vrot.slane %v830_v14, %v2859_v27 }
 0x23e   :  { %v1062_v10 = vsel %vm1057_vm2, %v735_v15, 0  ;;  %v738_v29 = vpack.i.b16 %v737_v16, %v736_v12  ;;  %v723_v31 = vrot.slane %v2325_v5, %v2853_v23  ;;  %v657_v35 = vcombine.high %v656_v30, %v2717_v59 }
 0x23f   :  { %v845_v33 = vcombine.high %v821_v18, %v2709_v0  ;;  %v846_v34 = vcombine.high %v828_v21, %v2709_v0  ;;  %2401 = vmatpush3.bf16.xpose.msra.mxu1 %v1062_v10  ;;  %v847_v36 = vcombine.high %v837_v24, %v2709_v0  ;;  %v848_v37 = vcombine.high %v844_v25, %v2709_v0 }
 0x240   :  { %v2326_v38 = vpack.c.bf16 %v837_v24, %v821_v18  ;;  %v2327_v39 = vpack.c.bf16 %v844_v25, %v828_v21  ;;  %2412 = vmatprep.subr.bf16.mxu1 %v2709_v0  ;;  %v2316_v40 = vpack.c.bf16 %v315_v54, %v2970_v26  ;;  %v1108_v42 = vsel %vm1057_vm2, %v738_v29, 0 }
 0x241   :  { %v741_v45 = vpack.i.b16 %v682_v22, %v657_v35  ;;  %v743_v47 = vshrl.u32 %v682_v22, 16  ;;  %v2328_v50 = vpack.c.bf16 %v847_v36, %v845_v33  ;;  %v2329_v30 = vpack.c.bf16 %v848_v37, %v846_v34  ;;  %2407 = vmatpush3.bf16.xpose.msra.mxu0 %v1108_v42 }
 0x242   :  { %v940_v48 = vrot.slane %v2326_v38, %v2853_v23  ;;  %v948_v49 = vrot.slane %v2327_v39, %v2853_v23  ;;  %v2317_v51 = vpack.c.bf16 %v316_v63, %v2974_v28  ;;  %2418 = vmatprep.subr.bf16.mxu0 %v2709_v0  ;;  %v742_v52 = vshrl.u32 %v657_v35, 16 }
 0x243   :  { %v699_v53 = vcombine.low %v690_v4, %v698_v8  ;;  %v724_v55 = vcombine.low %v715_v17, %v723_v31  ;;  %v965_v26 = vrot.slane %v2328_v50, %v2853_v23  ;;  %v973_v54 = vrot.slane %v2329_v30, %v2853_v23 }
 0x244   :  { %v949_v57 = vcombine.low %v940_v48, %v948_v49  ;;  %v2314_v62 = vpack.c.bf16 %v2963_v19, %v2945_v43  ;;  %v2315_v5 = vpack.c.bf16 %v2966_v20, %v2948_v44  ;;  %v744_v7 = vpack.i.b16 %v743_v47, %v742_v52 }
 0x245   :  { %v731_v9 = vrot.slane %v724_v55, %v2859_v27  ;;  %v1154_v28 = vsel %vm1057_vm2, %v741_v45, 0  ;;  %v974_v4 = vcombine.low %v965_v26, %v973_v54  ;;  %v415_v8 = vrot.slane %v2316_v40, %v2853_v23 }
 0x246   :  { %2403 = vmatmul.mubr.msk.bf16.vlgmr.msra.gmra.mrb[0].mxu1 %vm1057_vm2, %v435_v61  ;;  %v3029_v63 = vrot.slane %v949_v57, %v2859_v27  ;;  %v423_v43 = vrot.slane %v2317_v51, %v2853_v23  ;;  %v706_v44 = vrot.slane %v699_v53, %v2859_v27  ;;  %v390_v61 = vrot.slane %v2314_v62, %v2853_v23 }
 0x247   :  { %2413 = vmatpush3.bf16.xpose.msra.mxu1 %v1154_v28  ;;  %2414 = vmatprep.mubr.msk.bf16.mxu1 %vm2710_vm0, %v2709_v0  ;;  %v3038_v56 = vrot.slane %v974_v4, %v2859_v27  ;;  %v398_v19 = vrot.slane %v2315_v5, %v2853_v23  ;;  %v1200_v20 = vsel %vm1057_vm2, %v744_v7, 0  ;;  %v749_v11 = vshrl.u32 %v731_v9, 16 }
 0x248   :  { %2424 = vmatprep.subr.bf16.mxu1 %v2709_v0  ;;  %v3042_v58 = vcombine.high %v3029_v63, %v2717_v59  ;;  %2409 = vmatmul.mubr.msk.bf16.vlgmr.msra.gmra.mrb[4].mxu0 %vm1057_vm2, %v2916_v2  ;;  %v747_v12 = vpack.i.b16 %v731_v9, %v706_v44  ;;  %v748_v14 = vshrl.u32 %v706_v44, 16  ;;  %v424_v15 = vcombine.low %v415_v8, %v423_v43 }
 0x249   :  { %2419 = vmatpush3.bf16.xpose.msra.mxu0 %v1200_v20  ;;  %2420 = vmatprep.mubr.msk.bf16.mxu0 %vm2710_vm0, %v2709_v0  ;;  %v3053_v13 = vcombine.high %v3038_v56, %v2717_v59  ;;  %v399_v18 = vcombine.low %v390_v61, %v398_v19  ;;  %v732_v22 = vcombine.high %v731_v9, %v2717_v59  ;;  %v1037_v45 = vshrl.u32 %v3038_v56, 16 }
 0x24a   :  { %2430 = vmatprep.subr.bf16.mxu0 %v2709_v0  ;;  %v1042_v2 = vshrl.u32 %v3042_v58, 16  ;;  %v750_v21 = vpack.i.b16 %v749_v11, %v748_v14  ;;  %v1246_v24 = vsel %vm1057_vm2, %v747_v12, 0  ;;  %v431_v10 = vrot.slane %v424_v15, %v2859_v27 }
 0x24b   :  { %v1041_v16 = vpack.i.b16 %v3053_v13, %v3042_v58  ;;  %v1043_v17 = vshrl.u32 %v3053_v13, 16  ;;  %v707_v29 = vcombine.high %v706_v44, %v2717_v59  ;;  %v406_v1 = vrot.slane %v399_v18, %v2859_v27 }
 0x24c   :  { %v1292_v60 = vsel %vm1057_vm2, %v750_v21, 0  ;;  %v449_v33 = vshrl.u32 %v431_v10, 16  ;;  %v432_v39 = vcombine.high %v431_v10, %v2717_v59  ;;  %v1035_v47 = vpack.i.b16 %v3038_v56, %v3029_v63 }
 0x24d   :  { %v3066_v25 = vpack.i.b16 %v1043_v17, %v1042_v2  ;;  %v753_v31 = vpack.i.b16 %v732_v22, %v707_v29  ;;  %v754_v34 = vshrl.u32 %v707_v29, 16  ;;  %v447_v35 = vpack.i.b16 %v431_v10, %v406_v1 }
 0x24e   :  { %2415 = vmatmul.mubr.msk.bf16.vlgmr.msra.gmra.mrb[4].mxu1 %vm1057_vm2, %v441_v3  ;;  %v755_v3 = vshrl.u32 %v732_v22, 16  ;;  %v448_v36 = vshrl.u32 %v406_v1, 16  ;;  %v407_v42 = vcombine.high %v406_v1, %v2717_v59  ;;  %v455_v48 = vshrl.u32 %v432_v39, 16 }
 0x24f   :  { %2425 = vmatpush3.bf16.xpose.msra.mxu1 %v1246_v24  ;;  %2426 = vmatprep.mubr.msk.bf16.mxu1 %vm2710_vm0, %v2709_v0  ;;  %v1036_v49 = vshrl.u32 %v3029_v63, 16  ;;  %v1511_v52 = vsel %vm1509_vm3, %v1035_v47, 0 }
 0x250   :  { %2436 = vmatprep.subr.bf16.mxu1 %v2709_v0  ;;  %2421 = vmatmul.mubr.msk.bf16.vlgmr.msra.gmra.mrb[8].mxu0 %vm1057_vm2, %v2922_v6  ;;  %v756_v37 = vpack.i.b16 %v755_v3, %v754_v34  ;;  %v1338_v6 = vsel %vm1057_vm2, %v753_v31, 0  ;;  %v450_v38 = vpack.i.b16 %v449_v33, %v448_v36  ;;  %v453_v50 = vpack.i.b16 %v432_v39, %v407_v42  ;;  %v760_v39 = vpop.permute.xlu1 %759 }
 0x251   :  { %2431 = vmatpush3.bf16.xpose.msra.mxu0 %v1292_v60  ;;  %2432 = vmatprep.mubr.msk.bf16.mxu0 %vm2710_vm0, %v2709_v0  ;;  %v454_v30 = vshrl.u32 %v407_v42, 16  ;;  %v1038_v51 = vpack.i.b16 %v1037_v45, %v1036_v49 }
 0x252   :  { %2442 = vmatprep.subr.bf16.mxu0 %v2709_v0  ;;  %v1384_v40 = vsel %vm1057_vm2, %v756_v37, 0 }
 0x253   :  { %v456_v53 = vpack.i.b16 %v455_v48, %v454_v30  ;;  %v1557_v55 = vsel %vm1509_vm3, %v1038_v51, 0 }
 0x256   :  { %2427 = vmatmul.mubr.msk.bf16.vlgmr.msra.gmra.mrb[8].mxu1 %vm1057_vm2, %v447_v35 }
 0x257   :  { %2437 = vmatpush3.bf16.xpose.msra.mxu1 %v1338_v6  ;;  %2438 = vmatprep.mubr.msk.bf16.mxu1 %vm2710_vm0, %v2709_v0 }
 0x258   :  { %2448 = vmatprep.subr.bf16.mxu1 %v2709_v0  ;;  %2433 = vmatmul.mubr.msk.bf16.vlgmr.msra.gmra.mrb[12].mxu0 %vm1057_vm2, %v450_v38 }
 0x259   :  { %2443 = vmatpush3.bf16.xpose.msra.mxu0 %v1384_v40  ;;  %2444 = vmatprep.mubr.msk.bf16.mxu0 %vm2710_vm0, %v2709_v0 }
 0x25a   :  { %2454 = vmatprep.subr.bf16.mxu0 %v2709_v0 }
 0x25e   :  { %2439 = vmatmul.mubr.msk.bf16.vlgmr.msra.gmra.mrb[12].mxu1 %vm1057_vm2, %v453_v50 }
 0x25f   :  { %2449 = vmatpush3.bf16.msra.mxu1 %v1511_v52  ;;  %2450 = vmatprep.mubr.msk.bf16.mxu1 %vm2710_vm0, %v2709_v0 }
 0x260   :  { %2460 = vmatprep.subr.bf16.mxu1 %v2709_v0  ;;  %2445 = vmatmul.mubr.msk.bf16.vlgmr.msra.gmra.mrb[16].mxu0 %vm1057_vm2, %v456_v53 }
 0x261   :  { %2455 = vmatpush3.bf16.msra.mxu0 %v1557_v55  ;;  %2456 = vmatprep.mubr.msk.bf16.mxu0 %vm2710_vm0, %v2709_v0 }
 0x262   :  { %2466 = vmatprep.subr.bf16.mxu0 %v2709_v0 }
 0x319   :  { %v1098_v26 = vpop.f32.mrb[0].mxu1 }
 0x31a   :  { %v2404_v54 = vpop.f32.mrb[1].mxu1  ;;  %v1426_v57 = vsel %vm1057_vm2, %v1098_v26, -inf }
 0x31b   :  { %1427 = vmax.xlane.f32.xlu0 %v1426_v57  ;;  %v1101_v62 = vpop.f32.mrb[2].mxu1  ;;  %v1144_v5 = vpop.f32.mrb[4].mxu0 }
 0x31c   :  { %v2405_v7 = vpop.f32.mrb[3].mxu1  ;;  %v2410_v9 = vpop.f32.mrb[5].mxu0  ;;  %v1429_v28 = vsel %vm1057_vm2, %v1144_v5, -inf }
 0x31d   :  { %1430 = vmax.xlane.f32.xlu1 %v1429_v28  ;;  %v1147_v63 = vpop.f32.mrb[6].mxu0  ;;  %v1603_v7 = vsel %vm1509_vm3, %v1041_v16, 0 }
 0x31e   :  { %v2411_v4 = vpop.f32.mrb[7].mxu0 }
 0x31f   :  { %v1649_v4 = vsel %vm1509_vm3, %v3066_v25, 0 }
 0x321   :  { %v1190_v8 = vpop.f32.mrb[4].mxu1 }
 0x322   :  { %v2416_v43 = vpop.f32.mrb[5].mxu1  ;;  %v1432_v44 = vsel %vm1057_vm2, %v1190_v8, -inf }
 0x323   :  { %1433 = vmax.xlane.f32.xlu0 %v1432_v44  ;;  %v1193_v56 = vpop.f32.mrb[6].mxu1  ;;  %v1236_v61 = vpop.f32.mrb[8].mxu0 }
 0x324   :  { %v2417_v19 = vpop.f32.mrb[7].mxu1  ;;  %v2422_v20 = vpop.f32.mrb[9].mxu0  ;;  %v1435_v11 = vsel %vm1057_vm2, %v1236_v61, -inf }
 0x325   :  { %1436 = vmax.xlane.f32.xlu1 %v1435_v11  ;;  %v1239_v12 = vpop.f32.mrb[10].mxu0 }
 0x326   :  { %v2423_v14 = vpop.f32.mrb[11].mxu0 }
 0x329   :  { %v1282_v15 = vpop.f32.mrb[8].mxu1 }
 0x32a   :  { %v2428_v2 = vpop.f32.mrb[9].mxu1  ;;  %v1438_v17 = vsel %vm1057_vm2, %v1282_v15, -inf }
 0x32b   :  { %1439 = vmax.xlane.f32.xlu0 %v1438_v17  ;;  %v1285_v18 = vpop.f32.mrb[10].mxu1  ;;  %v3111_v21 = vpop.f32.mrb[12].mxu0 }
 0x32c   :  { %v2429_v22 = vpop.f32.mrb[11].mxu1  ;;  %v2434_v24 = vpop.f32.mrb[13].mxu0  ;;  %v1441_v29 = vsel %vm1057_vm2, %v3111_v21, -inf }
 0x32d   :  { %v1331_v10 = vpop.f32.mrb[14].mxu0 }
 0x32e   :  { %v2435_v60 = vpop.f32.mrb[15].mxu0 }
 0x32f   :  { %1442 = vmax.xlane.f32.xlu0 %v1441_v29 }
 0x331   :  { %v3115_v1 = vpop.f32.mrb[12].mxu1 }
 0x332   :  { %v2440_v3 = vpop.f32.mrb[13].mxu1  ;;  %v1444_v38 = vsel %vm1057_vm2, %v3115_v1, -inf }
 0x333   :  { %v1377_v31 = vpop.f32.mrb[14].mxu1  ;;  %v3117_v33 = vpop.f32.mrb[16].mxu0 }
 0x334   :  { %v2441_v34 = vpop.f32.mrb[15].mxu1  ;;  %v2446_v35 = vpop.f32.mrb[17].mxu0  ;;  %v1447_v6 = vsel %vm1057_vm2, %v3117_v33, -inf }
 0x335   :  { %v1423_v36 = vpop.f32.mrb[18].mxu0 }
 0x336   :  { %767 = vrot.lane.b32.xlu1 %v2875_v41, %s2704_s30  ;;  %v2447_v37 = vpop.f32.mrb[19].mxu0 }
 0x33a   :  { %771 = vrot.lane.b32.xlu1 %v2881_v46, %s2704_s30 }
 0x345   :  { %763 = vrot.lane.b32.xlu0 %v2865_v32, %s2704_s30  ;;  %s2718_s30 = smov 16  }
 0x35e   :  { %1448 = vmax.xlane.f32.xlu1 %v1447_v6 }
 0x364   :  { %1445 = vmax.xlane.f32.xlu0 %v1444_v38 }
 0x3a8   :  { %v1428_v40 = vpop.xlane.xlu0 %1427 }
 0x3a9   :  { %v1450_v42 = vsub.f32 %v1098_v26, %v1428_v40 }
 0x3aa   :  { %v1431_v41 = vpop.xlane.xlu1 %1430 }
 0x3ab   :  { %v1458_v45 = vmul.f32 1.442695, %v1450_v42  ;;  %v1451_v47 = vsub.f32 %v1144_v5, %v1431_v41 }
 0x3ad   :  { %2530 = vpow2.f32 %v1458_v45  ;;  %v1460_v48 = vmul.f32 1.442695, %v1451_v47 }
 0x3af   :  { %2532 = vpow2.f32 %v1460_v48 }
 0x3b0   :  { %v1434_v46 = vpop.xlane.xlu0 %1433 }
 0x3b1   :  { %v1452_v49 = vsub.f32 %v1190_v8, %v1434_v46 }
 0x3b2   :  { %v1437_v50 = vpop.xlane.xlu1 %1436 }
 0x3b3   :  { %v1462_v32 = vmul.f32 1.442695, %v1452_v49  ;;  %v1453_v30 = vsub.f32 %v1236_v61, %v1437_v50 }
 0x3b5   :  { %2534 = vpow2.f32 %v1462_v32  ;;  %v1464_v51 = vmul.f32 1.442695, %v1453_v30 }
 0x3b6   :  { %v768_v62 = vpop.permute.xlu1 %767 }
 0x3b7   :  { %v2531_v52 = vpop.eup %2530  ;;  %2536 = vpow2.f32 %v1464_v51  ;;  %v849_v58 = vcombine.low %v760_v39, %v768_v62  ;;  %v850_v13 = vcombine.high %v760_v39, %v768_v62 }
 0x3b8   :  { %v1440_v53 = vpop.xlane.xlu0 %1439  ;;  %v1474_v55 = vsel %vm1057_vm2, %v2531_v52, 0.0  ;;  %v1498_v26 = vpack.c.bf16 %v2531_v52, %v2531_v52 }
 0x3b9   :  { %v1454_v54 = vsub.f32 %v1282_v15, %v1440_v53  ;;  %1475 = vadd.xlane.f32.xlu0 %v1474_v55  ;;  %v2533_v57 = vpop.eup %2532  ;;  %v857_v12 = vrot.slane %v849_v58, %v2853_v23  ;;  %v864_v14 = vrot.slane %v850_v13, %v2853_v23 }
 0x3ba   :  { %2451 = vmatmul.mubr.msk.bf16.vlgmr.msra.gmra.mrb[16].mxu1 %vm1057_vm2, %v1498_v26  ;;  %v1499_v9 = vpack.c.bf16 %v2533_v57, %v2533_v57  ;;  %v1477_v63 = vsel %vm1057_vm2, %v2533_v57, 0.0  ;;  %v772_v44 = vpop.permute.xlu1 %771 }
 0x3bb   :  { %v1466_v5 = vmul.f32 1.442695, %v1454_v54  ;;  %2461 = vmatpush3.bf16.msra.mxu1 %v1603_v7  ;;  %2462 = vmatprep.mubr.msk.bf16.mxu1 %vm2710_vm0, %v2709_v0 }
 0x3bc   :  { %v1443_v28 = vpop.xlane.xlu0 %1442  ;;  %2457 = vmatmul.mubr.msk.bf16.vlgmr.msra.gmra.mrb[20].mxu0 %vm1057_vm2, %v1499_v9  ;;  %2472 = vmatprep.subr.bf16.mxu1 %v2709_v0 }
 0x3bd   :  { %2538 = vpow2.f32 %v1466_v5  ;;  %v1455_v8 = vsub.f32 %v3111_v21, %v1443_v28  ;;  %1478 = vadd.xlane.f32.xlu0 %v1477_v63  ;;  %2467 = vmatpush3.bf16.msra.mxu0 %v1649_v4 }
 0x3be   :  { %2468 = vmatprep.mubr.msk.bf16.mxu0 %vm2710_vm0, %v2709_v0  ;;  %2478 = vmatprep.subr.bf16.mxu0 %v2709_v0 }
 0x3bf   :  { %v2535_v16 = vpop.eup %2534  ;;  %v1468_v43 = vmul.f32 1.442695, %v1455_v8 }
 0x3c0   :  { %v764_v56 = vpop.permute.xlu0 %763  ;;  %v1480_v61 = vsel %vm1057_vm2, %v2535_v16, 0.0  ;;  %v1500_v25 = vpack.c.bf16 %v2535_v16, %v2535_v16 }
 0x3c1   :  { %2540 = vpow2.f32 %v1468_v43  ;;  %v865_v19 = vcombine.low %v764_v56, %v772_v44  ;;  %v866_v20 = vcombine.high %v764_v56, %v772_v44  ;;  %1481 = vadd.xlane.f32.xlu1 %v1480_v61  ;;  %v2537_v11 = vpop.eup %2536 }
 0x3c2   :  { %2463 = vmatmul.mubr.msk.bf16.vlgmr.msra.gmra.mrb[20].mxu1 %vm1057_vm2, %v1500_v25  ;;  %v1483_v17 = vsel %vm1057_vm2, %v2537_v11, 0.0  ;;  %v1501_v18 = vpack.c.bf16 %v2537_v11, %v2537_v11 }
 0x3c3   :  { %v873_v15 = vrot.slane %v865_v19, %v2853_v23  ;;  %v880_v2 = vrot.slane %v866_v20, %v2853_v23  ;;  %1484 = vadd.xlane.f32.xlu0 %v1483_v17  ;;  %2474 = vmatprep.mubr.msk.bf16.mxu1 %vm2710_vm0, %v2709_v0 }
 0x3c4   :  { %2469 = vmatmul.mubr.msk.bf16.vlgmr.msra.gmra.mrb[24].mxu0 %vm1057_vm2, %v1501_v18 }
 0x3c5   :  { %v881_v21 = vcombine.low %v857_v12, %v873_v15  ;;  %v882_v22 = vcombine.high %v857_v12, %v873_v15  ;;  %v897_v24 = vcombine.low %v864_v14, %v880_v2  ;;  %v898_v10 = vcombine.high %v864_v14, %v880_v2  ;;  %2480 = vmatprep.mubr.msk.bf16.mxu0 %vm2710_vm0, %v2709_v0 }
 0x3c7   :  { %v2539_v29 = vpop.eup %2538  ;;  %v889_v60 = vrot.slane %v881_v21, %v2859_v27  ;;  %v896_v3 = vrot.slane %v882_v22, %v2859_v27  ;;  %v905_v31 = vrot.slane %v897_v24, %v2859_v27  ;;  %v912_v34 = vrot.slane %v898_v10, %v2859_v27 }
 0x3c8   :  { %v1486_v35 = vsel %vm1057_vm2, %v2539_v29, 0.0  ;;  %v1502_v4 = vpack.c.bf16 %v2539_v29, %v2539_v29 }
 0x3c9   :  { %v913_v36 = vcombine.high %v889_v60, %v2709_v0  ;;  %v914_v37 = vcombine.high %v896_v3, %v2709_v0  ;;  %v915_v6 = vcombine.high %v905_v31, %v2709_v0  ;;  %v916_v38 = vcombine.high %v912_v34, %v2709_v0  ;;  %1487 = vadd.xlane.f32.xlu1 %v1486_v35 }
 0x3ca   :  { %v2330_v39 = vpack.c.bf16 %v905_v31, %v889_v60  ;;  %v2331_v40 = vpack.c.bf16 %v912_v34, %v896_v3 }
 0x3cb   :  { %v2541_v42 = vpop.eup %2540  ;;  %v2332_v45 = vpack.c.bf16 %v915_v6, %v913_v36  ;;  %v2333_v41 = vpack.c.bf16 %v916_v38, %v914_v37 }
 0x3cc   :  { %v990_v47 = vrot.slane %v2330_v39, %v2853_v23  ;;  %v998_v48 = vrot.slane %v2331_v40, %v2853_v23  ;;  %v1489_v46 = vsel %vm1057_vm2, %v2541_v42, 0.0  ;;  %v1503_v13 = vpack.c.bf16 %v2541_v42, %v2541_v42 }
 0x3cd   :  { %v1015_v49 = vrot.slane %v2332_v45, %v2853_v23  ;;  %v1023_v32 = vrot.slane %v2333_v41, %v2853_v23  ;;  %1490 = vadd.xlane.f32.xlu0 %v1489_v46 }
 0x3ce   :  { %v999_v50 = vcombine.low %v990_v47, %v998_v48 }
 0x3cf   :  { %v1024_v30 = vcombine.low %v1015_v49, %v1023_v32 }
 0x3d0   :  { %v1006_v51 = vrot.slane %v999_v50, %v2859_v27 }
 0x3d1   :  { %v1031_v52 = vrot.slane %v1024_v30, %v2859_v27 }
 0x3d2   :  { %v1007_v53 = vcombine.high %v1006_v51, %v2717_v59  ;;  %v1048_v54 = vshrl.u32 %v1006_v51, 16 }
 0x3d3   :  { %v1047_v55 = vpack.i.b16 %v1031_v52, %v1006_v51  ;;  %v1049_v26 = vshrl.u32 %v1031_v52, 16  ;;  %v1032_v57 = vcombine.high %v1031_v52, %v2717_v59 }
 0x3d4   :  { %v1054_v62 = vshrl.u32 %v1007_v53, 16 }
 0x3d5   :  { %v1695_v5 = vsel %vm1509_vm3, %v1047_v55, 0  ;;  %v1050_v7 = vpack.i.b16 %v1049_v26, %v1048_v54  ;;  %v1053_v9 = vpack.i.b16 %v1032_v57, %v1007_v53  ;;  %v1055_v28 = vshrl.u32 %v1032_v57, 16 }
 0x3d6   :  { %2473 = vmatpush3.bf16.msra.mxu1 %v1695_v5 }
 0x3d7   :  { %v1741_v63 = vsel %vm1509_vm3, %v1050_v7, 0  ;;  %2484 = vmatprep.subr.bf16.mxu1 %v2709_v0  ;;  %v1056_v8 = vpack.i.b16 %v1055_v28, %v1054_v62  ;;  %v1787_v58 = vsel %vm1509_vm3, %v1053_v9, 0 }
 0x3d8   :  { %2479 = vmatpush3.bf16.msra.mxu0 %v1741_v63 }
 0x3d9   :  { %2475 = vmatmul.mubr.msk.bf16.vlgmr.msra.gmra.mrb[24].mxu1 %vm1057_vm2, %v1502_v4  ;;  %2490 = vmatprep.subr.bf16.mxu0 %v2709_v0  ;;  %v1833_v16 = vsel %vm1509_vm3, %v1056_v8, 0 }
 0x3da   :  { %2485 = vmatpush3.bf16.msra.mxu1 %v1787_v58  ;;  %2486 = vmatprep.mubr.msk.bf16.mxu1 %vm2710_vm0, %v2709_v0 }
 0x3db   :  { %2481 = vmatmul.mubr.msk.bf16.vlgmr.msra.gmra.mrb[28].mxu0 %vm1057_vm2, %v1503_v13  ;;  %2496 = vmatprep.subr.bf16.mxu1 %v2709_v0 }
 0x3dc   :  { %2491 = vmatpush3.bf16.msra.mxu0 %v1833_v16  ;;  %2492 = vmatprep.mubr.msk.bf16.mxu0 %vm2710_vm0, %v2709_v0 }
 0x3eb   :  { %v1449_v43 = vpop.xlane.xlu1 %1448 }
 0x3ec   :  { %v1457_v44 = vsub.f32 %v3117_v33, %v1449_v43 }
 0x3ee   :  { %v1472_v56 = vmul.f32 1.442695, %v1457_v44 }
 0x3f0   :  { %2542 = vpow2.f32 %v1472_v56 }
 0x3f1   :  { %v1446_v61 = vpop.xlane.xlu0 %1445 }
 0x3f2   :  { %v1456_v25 = vsub.f32 %v3115_v1, %v1446_v61 }
 0x3f4   :  { %v1470_v19 = vmul.f32 1.442695, %v1456_v25 }
 0x3f6   :  { %2544 = vpow2.f32 %v1470_v19 }
 0x3fa   :  { %v2543_v20 = vpop.eup %2542 }
 0x3fb   :  { %v1495_v11 = vsel %vm1057_vm2, %v2543_v20, 0.0  ;;  %v1505_v12 = vpack.c.bf16 %v2543_v20, %v2543_v20 }
 0x3fc   :  { %1496 = vadd.xlane.f32.xlu0 %v1495_v11 }
 0x3fd   :  { %2493 = vmatmul.mubr.msk.bf16.vlgmr.msra.gmra.mrb[32].mxu0 %vm1057_vm2, %v1505_v12 }
 0x400   :  { %v2545_v14 = vpop.eup %2544 }
 0x401   :  { %v1492_v15 = vsel %vm1057_vm2, %v2545_v14, 0.0  ;;  %v1504_v2 = vpack.c.bf16 %v2545_v14, %v2545_v14 }
 0x402   :  { %1493 = vadd.xlane.f32.xlu1 %v1492_v15 }
 0x403   :  { %2487 = vmatmul.mubr.msk.bf16.vlgmr.msra.gmra.mrb[28].mxu1 %vm1057_vm2, %v1504_v2 }
 0x404   :  { %2500 = vmatprep.mubr.msk.bf16.mxu1 %vm2710_vm0, %v2709_v0 }
 0x446   :  { %v1476_v1 = vpop.xlane.xlu0 %1475 }
 0x447   :  { %2546 = vrcp.f32 %v1476_v1 }
 0x44a   :  { %v1479_v33 = vpop.xlane.xlu0 %1478 }
 0x44b   :  { %2548 = vrcp.f32 %v1479_v33 }
 0x44e   :  { %v1482_v17 = vpop.xlane.xlu1 %1481 }
 0x44f   :  { %2550 = vrcp.f32 %v1482_v17 }
 0x450   :  { %v1485_v18 = vpop.xlane.xlu0 %1484 }
 0x451   :  { %2552 = vrcp.f32 %v1485_v18  ;;  %v2547_v3 = vpop.eup %2546 }
 0x455   :  { %v2549_v36 = vpop.eup %2548 }
 0x459   :  { %v2551_v6 = vpop.eup %2550 }
 0x45b   :  { %v2553_v45 = vpop.eup %2552 }
 0x48d   :  { %v1547_v21 = vpop.f32.mrb[16].mxu1 }
 0x48e   :  { %v2452_v22 = vpop.f32.mrb[17].mxu1  ;;  %v1883_v34 = vmul.f32 %v2547_v3, %v1547_v21 }
 0x48f   :  { %v1550_v24 = vpop.f32.mrb[18].mxu1  ;;  %v1593_v10 = vpop.f32.mrb[20].mxu0 }
 0x490   :  { %v2453_v29 = vpop.f32.mrb[19].mxu1  ;;  %v2458_v60 = vpop.f32.mrb[21].mxu0  ;;  %v1884_v37 = vmul.f32 %v2549_v36, %v1593_v10  ;;  %v1891_v39 = vpack.c.bf16 %v1883_v34, %v1883_v34 }
 0x491   :  { %v1596_v31 = vpop.f32.mrb[22].mxu0 }
 0x492   :  { %v2459_v35 = vpop.f32.mrb[23].mxu0  ;;  %v1925_v48 = vpack.c.bf16 %v1884_v37, %v1884_v37  ;;  %v1898_v51 = vrot.slane %v1891_v39, %v2853_v23 }
 0x494   :  { %v1932_v54 = vrot.slane %v1925_v48, %v2853_v23  ;;  %v1488_v48 = vpop.xlane.xlu1 %1487 }
 0x495   :  { %v1639_v38 = vpop.f32.mrb[20].mxu1 }
 0x496   :  { %v1885_v40 = vmul.f32 %v2551_v6, %v1639_v38  ;;  %v2464_v42 = vpop.f32.mrb[21].mxu1 }
 0x497   :  { %v1642_v41 = vpop.f32.mrb[22].mxu1  ;;  %v1685_v47 = vpop.f32.mrb[24].mxu0 }
 0x498   :  { %v1899_v46 = vpack.c.bf16 %v1885_v40, %v1885_v40  ;;  %v1886_v49 = vmul.f32 %v2553_v45, %v1685_v47  ;;  %v2465_v32 = vpop.f32.mrb[23].mxu1  ;;  %v2470_v50 = vpop.f32.mrb[25].mxu0 }
 0x499   :  { %v1688_v30 = vpop.f32.mrb[26].mxu0  ;;  %v1491_v41 = vpop.xlane.xlu0 %1490 }
 0x49a   :  { %v1906_v52 = vrot.slane %v1899_v46, %v2853_v23  ;;  %v1933_v53 = vpack.c.bf16 %v1886_v49, %v1886_v49  ;;  %v2471_v55 = vpop.f32.mrb[27].mxu0  ;;  %2554 = vrcp.f32 %v1491_v41  ;;  %v1494_v46 = vpop.xlane.xlu1 %1493 }
 0x49c   :  { %v1907_v26 = vcombine.low %v1898_v51, %v1906_v52  ;;  %v1908_v57 = vcombine.high %v1898_v51, %v1906_v52  ;;  %v1940_v62 = vrot.slane %v1933_v53, %v2853_v23 }
 0x49d   :  { %v1497_v47 = vpop.xlane.xlu0 %1496 }
 0x49e   :  { %v1915_v5 = vrot.slane %v1907_v26, %v2859_v27  ;;  %v1922_v7 = vrot.slane %v1908_v57, %v2859_v27  ;;  %v1941_v9 = vcombine.low %v1932_v54, %v1940_v62  ;;  %v1942_v28 = vcombine.high %v1932_v54, %v1940_v62 }
 0x49f   :  { %2556 = vrcp.f32 %v1497_v47 }
 0x4a0   :  { %v1923_v63 = vcombine.high %v1915_v5, %v2717_v59  ;;  %v1949_v4 = vrot.slane %v1941_v9, %v2859_v27  ;;  %v1956_v8 = vrot.slane %v1942_v28, %v2859_v27  ;;  %v1924_v58 = vcombine.high %v1922_v7, %v2717_v59 }
 0x4a1   :  { %v2031_v13 = vshrl.u32 %v1915_v5, 16  ;;  %v2047_v25 = vshrl.u32 %v1922_v7, 16  ;;  %2558 = vrcp.f32 %v1488_v48 }
 0x4a2   :  { %v1957_v16 = vcombine.high %v1949_v4, %v2717_v59  ;;  %v1958_v43 = vcombine.high %v1956_v8, %v2717_v59  ;;  %v2029_v44 = vpack.i.b16 %v1949_v4, %v1915_v5  ;;  %v2032_v56 = vshrl.u32 %v1949_v4, 16 }
 0x4a3   :  { %v2039_v61 = vshrl.u32 %v1923_v63, 16  ;;  %v2045_v19 = vpack.i.b16 %v1956_v8, %v1922_v7  ;;  %v2048_v20 = vshrl.u32 %v1956_v8, 16  ;;  %v2055_v2 = vshrl.u32 %v1924_v58, 16 }
 0x4a4   :  { %v2033_v11 = vpack.i.b16 %v2032_v56, %v2031_v13  ;;  %v2037_v12 = vpack.i.b16 %v1957_v16, %v1923_v63  ;;  %v2040_v14 = vshrl.u32 %v1957_v16, 16  ;;  %v2053_v15 = vpack.i.b16 %v1958_v43, %v1924_v58  ;;  %v2555_v49 = vpop.eup %2554 }
 0x4a5   :  { %v2049_v1 = vpack.i.b16 %v2048_v20, %v2047_v25  ;;  %v2056_v33 = vshrl.u32 %v1958_v43, 16  ;;  %v2091_v17 = vcombine.low %v2029_v44, %v2045_v19  ;;  %2560 = vrcp.f32 %v1494_v46  ;;  %v2528_v46 = vld [vmem:[#allocation8] sm:$0xff]  }
 0x4a6   :  { %v2041_v18 = vpack.i.b16 %v2040_v14, %v2039_v61  ;;  %v2099_v21 = vcombine.low %v2037_v12, %v2053_v15  ;;  %2497 = vmatpush3.bf16.msra.mxu1 %v2528_v46 }
 0x4a7   :  { %v2057_v22 = vpack.i.b16 %v2056_v33, %v2055_v2  ;;  %v2141_v24 = vcombine.low %v2033_v11, %v2049_v1  ;;  %v2098_v10 = vrot.slane %v2091_v17, %v2853_v23  ;;  %2498 = vmatprep.subr.bf16.mxu1 %v2709_v0 }
 0x4a8   :  { %v2106_v29 = vrot.slane %v2099_v21, %v2853_v23 }
 0x4a9   :  { %v2149_v60 = vcombine.low %v2041_v18, %v2057_v22  ;;  %v3214_v35 = vrot.slane %v2141_v24, %v2853_v23  ;;  %v2557_v50 = vpop.eup %2556 }
 0x4aa   :  { %v3211_v31 = vcombine.low %v2098_v10, %v2106_v29 }
 0x4ab   :  { %v3217_v36 = vrot.slane %v2149_v60, %v2853_v23  ;;  %v2559_v51 = vpop.eup %2558 }
 0x4ac   :  { %v1731_v3 = vpop.f32.mrb[24].mxu1 }
 0x4ad   :  { %v2476_v34 = vpop.f32.mrb[25].mxu1  ;;  %v2173_v40 = vcombine.low %v3214_v35, %v3217_v36  ;;  %v1887_v54 = vmul.f32 %v2559_v51, %v1731_v3 }
 0x4ae   :  { %v1734_v37 = vpop.f32.mrb[26].mxu1  ;;  %v1777_v6 = vpop.f32.mrb[28].mxu0 }
 0x4af   :  { %v2477_v38 = vpop.f32.mrb[27].mxu1  ;;  %v2482_v39 = vpop.f32.mrb[29].mxu0  ;;  %v1888_v32 = vmul.f32 %v2555_v49, %v1777_v6  ;;  %v1959_v63 = vpack.c.bf16 %v1887_v54, %v1887_v54 }
 0x4b0   :  { %v1780_v42 = vpop.f32.mrb[30].mxu0  ;;  %v2561_v5 = vpop.eup %2560 }
 0x4b1   :  { %v2483_v45 = vpop.f32.mrb[31].mxu0  ;;  %v1993_v52 = vpack.c.bf16 %v1888_v32, %v1888_v32  ;;  %v1966_v61 = vrot.slane %v1959_v63, %v2853_v23 }
 0x4b3   :  { %v2000_v7 = vrot.slane %v1993_v52, %v2853_v23 }
 0x4d0   :  { %v1869_v30 = vpop.f32.mrb[32].mxu0 }
 0x4d1   :  { %v1890_v53 = vmul.f32 %v2557_v50, %v1869_v30  ;;  %v2494_v55 = vpop.f32.mrb[33].mxu0  ;;  %v2529_v30 = vld [vmem:[#allocation8 + $0x8] sm:$0xff]  }
 0x4d2   :  { %v1872_v26 = vpop.f32.mrb[34].mxu0  ;;  %2499 = vmatpush3.bf16.msra.mxu1 %v2529_v30 }
 0x4d3   :  { %v2001_v57 = vpack.c.bf16 %v1890_v53, %v1890_v53  ;;  %v2495_v62 = vpop.f32.mrb[35].mxu0  ;;  %v2130_v53 = vrot.slane %v3211_v31, %v2859_v27 }
 0x4d4   :  { %v2180_v62 = vrot.slane %v2173_v40, %v2859_v27 }
 0x4d5   :  { %v2008_v9 = vrot.slane %v2001_v57, %v2853_v23 }
 0x4d6   :  { %v1823_v28 = vpop.f32.mrb[28].mxu1 }
 0x4d7   :  { %v1889_v4 = vmul.f32 %v2561_v5, %v1823_v28  ;;  %v2488_v8 = vpop.f32.mrb[29].mxu1  ;;  %v2009_v58 = vcombine.low %v2000_v7, %v2008_v9  ;;  %v2010_v13 = vcombine.high %v2000_v7, %v2008_v9 }
 0x4d8   :  { %v1826_v16 = vpop.f32.mrb[30].mxu1 }
 0x4d9   :  { %v1967_v43 = vpack.c.bf16 %v1889_v4, %v1889_v4  ;;  %v2489_v44 = vpop.f32.mrb[31].mxu1  ;;  %v2017_v56 = vrot.slane %v2009_v58, %v2859_v27  ;;  %v2024_v19 = vrot.slane %v2010_v13, %v2859_v27 }
 0x4db   :  { %v1974_v25 = vrot.slane %v1967_v43, %v2853_v23  ;;  %v2025_v12 = vcombine.high %v2017_v56, %v2717_v59  ;;  %v2026_v2 = vcombine.high %v2024_v19, %v2717_v59  ;;  %v2064_v1 = vshrl.u32 %v2017_v56, 16  ;;  %v2350_v43 = vld [vmem:[#allocation10] ss:$0 sm:$0xff] }
 0x4dc   :  { %v2080_v24 = vshrl.u32 %v2024_v19, 16 }
 0x4dd   :  { %v1975_v20 = vcombine.low %v1966_v61, %v1974_v25  ;;  %v1976_v11 = vcombine.high %v1966_v61, %v1974_v25  ;;  %v2072_v22 = vshrl.u32 %v2025_v12, 16  ;;  %v2088_v6 = vshrl.u32 %v2026_v2, 16 }
 0x4df   :  { %v1983_v14 = vrot.slane %v1975_v20, %v2859_v27  ;;  %v1990_v15 = vrot.slane %v1976_v11, %v2859_v27 }
 0x4e1   :  { %v1991_v33 = vcombine.high %v1983_v14, %v2717_v59  ;;  %v1992_v17 = vcombine.high %v1990_v15, %v2717_v59  ;;  %v2061_v18 = vpack.i.b16 %v2017_v56, %v1983_v14  ;;  %v2063_v21 = vshrl.u32 %v1983_v14, 16 }
 0x4e2   :  { %v2077_v10 = vpack.i.b16 %v2024_v19, %v1990_v15  ;;  %v2079_v29 = vshrl.u32 %v1990_v15, 16 }
 0x4e3   :  { %v2065_v60 = vpack.i.b16 %v2064_v1, %v2063_v21  ;;  %v2069_v3 = vpack.i.b16 %v2025_v12, %v1991_v33  ;;  %v2071_v34 = vshrl.u32 %v1991_v33, 16  ;;  %v2085_v37 = vpack.i.b16 %v2026_v2, %v1992_v17 }
 0x4e4   :  { %v2081_v38 = vpack.i.b16 %v2080_v24, %v2079_v29  ;;  %v2087_v39 = vshrl.u32 %v1992_v17, 16  ;;  %v2107_v42 = vcombine.low %v2061_v18, %v2077_v10 }
 0x4e5   :  { %v2073_v45 = vpack.i.b16 %v2072_v22, %v2071_v34  ;;  %v2115_v41 = vcombine.low %v2069_v3, %v2085_v37 }
 0x4e6   :  { %v2089_v47 = vpack.i.b16 %v2088_v6, %v2087_v39  ;;  %v2157_v48 = vcombine.low %v2065_v60, %v2081_v38  ;;  %v2114_v59 = vrot.slane %v2107_v42, %v2853_v23 }
 0x4e7   :  { %v2122_v49 = vrot.slane %v2115_v41, %v2853_v23 }
 0x4e8   :  { %v2165_v32 = vcombine.low %v2073_v45, %v2089_v47  ;;  %v2164_v51 = vrot.slane %v2157_v48, %v2853_v23 }
 0x4e9   :  { %v2131_v50 = vcombine.low %v2114_v59, %v2122_v49 }
 0x4ea   :  { %v2172_v52 = vrot.slane %v2165_v32, %v2853_v23 }
 0x4eb   :  { %v2138_v55 = vrot.slane %v2131_v50, %v2859_v27 }
 0x4ec   :  { %v2181_v54 = vcombine.low %v2164_v51, %v2172_v52 }
 0x4ed   :  { %v2140_v26 = vcombine.high %v2130_v53, %v2138_v55  ;;  %v2139_v57 = vcombine.low %v2130_v53, %v2138_v55 }
 0x4ee   :  { %v2188_v0 = vrot.slane %v2181_v54, %v2859_v27 }
 0x4ef   :  { %v2194_v9 = vshrl.u32 %v2139_v57, 16  ;;  %v2200_v23 = vshrl.u32 %v2140_v26, 16 }
 0x4f0   :  { %v2190_v5 = vcombine.high %v2180_v62, %v2188_v0  ;;  %v2189_v7 = vcombine.low %v2180_v62, %v2188_v0 }
 0x4f2   :  { %v2199_v28 = vpack.i.b16 %v2190_v5, %v2140_v26  ;;  %v2195_v63 = vshrl.u32 %v2189_v7, 16  ;;  %v2201_v31 = vshrl.u32 %v2190_v5, 16  ;;  %v2193_v4 = vpack.i.b16 %v2189_v7, %v2139_v57 }
 0x4f4   :  { %2205 = vrot.lane.b32.xlu0 %v2199_v28, %s2718_s30  ;;  %v2196_v8 = vpack.i.b16 %v2195_v63, %v2194_v9  ;;  %v2202_v58 = vpack.i.b16 %v2201_v31, %v2200_v23 }
 0x4f6   :  { %2203 = vrot.lane.b32.xlu1 %v2196_v8, %s2719_s7 }
 0x4fa   :  { %2207 = vrot.lane.b32.xlu1 %v2202_v58, %s2720_s8 }
 0x566   :  { %v2206_v36 = vpop.permute.xlu0 %2205 }
 0x568   :  { %v2204_v35 = vpop.permute.xlu1 %2203 }
 0x569   :  { %v2211_v27 = vsel %vm1057_vm2, %v2193_v4, %v2204_v35 }
 0x56a   :  { %v2214_v13 = vsel %vm2212_vm4, %v2211_v27, %v2206_v36 }
 0x56c   :  { %v2208_v40 = vpop.permute.xlu1 %2207 }
 0x56d   :  { %v2217_v16 = vsel %vm2215_vm5, %v2214_v13, %v2208_v40 }
 0x56e   :  { %2501 = vmatmul.mubr.msk.bf16.vlgmr.msra.gmra.mrb[32].mxu1 %vm116_vm1, %v2217_v16 }
 0x641   :  { %v2277_v44 = vpop.f32.mrb[32].mxu1 }
 0x642   :  { %v2278_v56 = vadd.f32 %v2350_v43, %v2277_v44  ;;  %v2502_v61 = vpop.f32.mrb[33].mxu1 }
 0x643   :  { %v2280_v25 = vpop.f32.mrb[34].mxu1 }
 0x644   :  { %2284 = vst.msk [vmem:[#allocation11] sm:$0xff] %vm116_vm1, %v2278_v56  ;;  %v2281_v19 = vadd.f32 %v2350_v43, %v2280_v25  ;;  %v2503_v20 = vpop.f32.mrb[35].mxu1 }
 0x646   :  { %2285 = vst.msk [vmem:[#allocation11 + $0x8] sm:$0xff] %vm116_vm1, %v2281_v19 }
 0x647   :  { %2683 = shalt.err (!%p2680_p2)
}
 0x648   :  { %s2684_s14 = scalar_lea.hbm %s3269_s5, 256 }
 0x649   :  { %p2685_p3 = scmp.ne.s32.totalorder %s3269_s5, %s2684_s14  ;;  %p2688_p4 = scmp.lt.u32.totalorder %s2684_s14, %s3269_s5 }
 0x64b   :  { %p2690_p5 = pnand %p2688_p4, %p2685_p3 }
 0x64d   :  { %2693 = shalt.err (!%p2690_p5)
}
 0x64e   :  { %s2722_s1 = smov 128  }
 0x64f   :  { %2297 = dma.vmem_to_hbm [thread:$0]  %s2292_s10, 256, %s3269_s5, [#allocation4], %s2722_s1, %s2722_s1, %s2719_s7  }
 0x650   :  { %2700 = dma.done.wait [#allocation4], 256  }
 0x651   :  { %2701 = vsyncadd [#allocation4], 4294967040 }
 0x652   :  { %2301 = vsyncpa [#allocation3], 1 }
 0x653   :  { %2302 = vsyncpa [#allocation6], 1 }
 0x654   :  { %2303 = vsyncpa [#allocation9], 1 }
 0x655   :  { %2304 = vsyncpa [#allocation4], 1 }

</bundles_post_ra>
